<compile_context>
chip_gen: v5e
topology: v5e:2x2
jax: 0.10.0
libtpu: 0.0.40
codegen_flags: <defaults>
</compile_context>

<pallas_src>
import jax
import jax.numpy as jnp
import numpy as np
from jax import lax
from jax.experimental import pallas as pl
from jax.experimental.pallas import tpu as pltpu


# ---------------------------------------------------------------------------
# Fused kernel: [input projection] -> [LSTM recurrence] -> [pointer attention]
# ---------------------------------------------------------------------------
def _decoder_kernel(lens_ref, x_ref, mem_ref, h0_ref, c0_ref,
                    wih_ref, whh_ref, b_ref, align_ref, gx_sc, hs_sc):
    T, B, H = hs_sc.shape          # static scratch shape
    S = mem_ref.shape[0]

    # ---- Phase 1: hoisted input projection -------------------------------
    # One well-shaped (T*B, I) x (I, H) matmul per gate (gate-major layout so
    # no lane-dim slicing is ever needed). Bias folded in here.
    x2d = x_ref[...]                                           # (T*B, I) bf16
    for g in range(4):
        gx = jnp.dot(x2d, wih_ref[g],
                     preferred_element_type=jnp.float32) + b_ref[g]   # (T*B, H) f32
        gx_sc[pl.ds(g * T, T)] = gx.reshape(T, B, H)

    # ---- Phase 2: recurrence (only h @ W_hh inside the time loop) ---------
    whh0 = whh_ref[0]
    whh1 = whh_ref[1]
    whh2 = whh_ref[2]
    whh3 = whh_ref[3]

    def step(t, carry):
        h, c = carry                                           # (B, H) f32 each
        h_bf = h.astype(jnp.bfloat16)
        i_g = jax.nn.sigmoid(gx_sc[0 * T + t] +
                             jnp.dot(h_bf, whh0, preferred_element_type=jnp.float32))
        f_g = jax.nn.sigmoid(gx_sc[1 * T + t] +
                             jnp.dot(h_bf, whh1, preferred_element_type=jnp.float32))
        g_g = jnp.tanh(gx_sc[2 * T + t] +
                       jnp.dot(h_bf, whh2, preferred_element_type=jnp.float32))
        o_g = jax.nn.sigmoid(gx_sc[3 * T + t] +
                             jnp.dot(h_bf, whh3, preferred_element_type=jnp.float32))
        c_new = f_g * c + i_g * g_g
        h_new = o_g * jnp.tanh(c_new)
        hs_sc[t] = h_new.astype(jnp.bfloat16)                  # kept for attention
        return (h_new, c_new)

    lax.fori_loop(0, T, step, (h0_ref[0], c0_ref[0]), unroll=True)

    # ---- Phase 3: pointer attention (scores -> mask -> softmax) -----------
    hs = hs_sc[...]                                            # (T, B, H) bf16
    mem = mem_ref[...].astype(jnp.bfloat16)                    # (S, B, H) bf16
    col = lax.broadcasted_iota(jnp.int32, (T, S), 1)
    neg = jnp.float32(-1e30)                                   # finite: no NaN rows

    for b in range(B):                                         # B is small & static
        tgt_b = hs[:, b, :]                                    # (T, H)
        mem_b = mem[:, b, :]                                   # (S, H)
        # tgt @ mem^T without materializing the transpose:
        scores = lax.dot_general(tgt_b, mem_b, (((1,), (1,)), ((), ())),
                                 preferred_element_type=jnp.float32)   # (T, S)
        scores = jnp.where(col < lens_ref[b], scores, neg)
        m = jnp.max(scores, axis=-1, keepdims=True)
        e = jnp.exp(scores - m)
        denom = jnp.sum(e, axis=-1, keepdims=True)
        align_ref[b] = e * pl.reciprocal(denom, approx=True)


# ---------------------------------------------------------------------------
# PointerNetRNNDecoder.forward
# ---------------------------------------------------------------------------
def pointer_net_rnn_decoder(target, memory_bank, hidden, memory_lengths, params):
    h0, c0 = hidden
    T, B, I = target.shape
    S = memory_bank.shape[0]
    H = h0.shape[-1]

    x2d = target.reshape(T * B, I).astype(jnp.bfloat16)        # hoisted projection input
    wih = params["w_ih_gates"].astype(jnp.bfloat16)            # (4, I, H)
    whh = params["w_hh_gates"].astype(jnp.bfloat16)            # (4, H, H)
    bias = params["bias_gates"].astype(jnp.float32)            # (4, 1, H)  (b_ih + b_hh)
    lens = memory_lengths.astype(jnp.int32)                    # (B,)

    align = pl.pallas_call(
        _decoder_kernel,
        out_shape=jax.ShapeDtypeStruct((B, T, S), jnp.float32),
        in_specs=[
            pl.BlockSpec(memory_space=pltpu.MemorySpace.SMEM),   # memory_lengths
            pl.BlockSpec(memory_space=pltpu.MemorySpace.VMEM),   # x2d (T*B, I) bf16
            pl.BlockSpec(memory_space=pltpu.MemorySpace.VMEM),   # memory_bank (S, B, H)
            pl.BlockSpec(memory_space=pltpu.MemorySpace.VMEM),   # h0 (1, B, H)
            pl.BlockSpec(memory_space=pltpu.MemorySpace.VMEM),   # c0 (1, B, H)
            pl.BlockSpec(memory_space=pltpu.MemorySpace.VMEM),   # W_ih gates (4, I, H)
            pl.BlockSpec(memory_space=pltpu.MemorySpace.VMEM),   # W_hh gates (4, H, H)
            pl.BlockSpec(memory_space=pltpu.MemorySpace.VMEM),   # bias gates (4, 1, H)
        ],
        out_specs=pl.BlockSpec(memory_space=pltpu.MemorySpace.VMEM),
        scratch_shapes=[
            pltpu.VMEM((4 * T, B, H), jnp.float32),   # hoisted x@W_ih, gate-major
            pltpu.VMEM((T, B, H), jnp.bfloat16),      # LSTM hidden states for attention
        ],
    )(lens, x2d, memory_bank, h0, c0, wih, whh, bias)
    return align                                               # (B, T, S)


# ---------------------------------------------------------------------------
# Pure-JAX reference (same gate-major parametrization)
# ---------------------------------------------------------------------------
def reference(target, memory_bank, hidden, memory_lengths, params):
    h0, c0 = hidden
    wih = params["w_ih_gates"]     # (4, I, H)
    whh = params["w_hh_gates"]     # (4, H, H)
    b = params["bias_gates"]       # (4, 1, H)

    def step(carry, x):
        h, c = carry
        i = jax.nn.sigmoid(x @ wih[0] + h @ whh[0] + b[0])
        f = jax.nn.sigmoid(x @ wih[1] + h @ whh[1] + b[1])
        g = jnp.tanh(x @ wih[2] + h @ whh[2] + b[2])
        o = jax.nn.sigmoid(x @ wih[3] + h @ whh[3] + b[3])
        c = f * c + i * g
        h = o * jnp.tanh(c)
        return (h, c), h

    (_, _), hs = lax.scan(step, (h0[0], c0[0]), target)         # (T, B, H)
    mem = jnp.transpose(memory_bank, (1, 0, 2))                 # (B, S, H)
    tgt = jnp.transpose(hs, (1, 0, 2))                          # (B, T, H)
    scores = jnp.einsum('btd,bsd->bts', tgt, mem)
    mask = jnp.arange(mem.shape[1])[None, None, :] < memory_lengths[:, None, None]
    scores = jnp.where(mask, scores, -jnp.inf)
    return jax.nn.softmax(scores, axis=-1)


if __name__ == "__main__":
    B, T, S, I, H = 2, 8, 8, 32, 32
    key = jax.random.PRNGKey(0)
    ks = jax.random.split(key, 8)
    scale = 0.1

    target = jax.random.normal(ks[0], (T, B, I), jnp.float32) * scale
    memory_bank = jax.random.normal(ks[1], (S, B, H), jnp.float32) * scale
    h0 = jax.random.normal(ks[2], (1, B, H), jnp.float32) * scale
    c0 = jax.random.normal(ks[3], (1, B, H), jnp.float32) * scale
    memory_lengths = jnp.array([S, 5], dtype=jnp.int32)

    # Gate-major synthetic parameters (same parametrization as nn.LSTM with
    # i,f,g,o gate order; bias = b_ih + b_hh). linear_out.weight is kept only
    # for interface parity — its output (attn_h) is discarded by forward().
    params = {
        "w_ih_gates": jax.random.normal(ks[4], (4, I, H), jnp.float32) * scale,
        "w_hh_gates": jax.random.normal(ks[5], (4, H, H), jnp.float32) * scale,
        "bias_gates": jax.random.normal(ks[6], (4, 1, H), jnp.float32) * scale,
        "w_out_t":    jax.random.normal(ks[7], (2 * H, H), jnp.float32) * scale,
    }

    align = pointer_net_rnn_decoder(target, memory_bank, (h0, c0),
                                    memory_lengths, params)
    align = jax.block_until_ready(align)

    ref = jax.block_until_ready(
        reference(target, memory_bank, (h0, c0), memory_lengths, params))
    np.testing.assert_allclose(np.asarray(align), np.asarray(ref),
                               rtol=2e-2, atol=2e-2)

    print("KERNEL_OK")
</pallas_src>

<mosaic_0001>
module attributes {stable_mosaic.version = 11 : i64} {
  func.func @_decoder_kernel(%arg0: memref<2xi32, #tpu.memory_space<smem>>, %arg1: memref<16x32xbf16, #tpu.memory_space<vmem>>, %arg2: memref<8x2x32xf32, #tpu.memory_space<vmem>>, %arg3: memref<1x2x32xf32, #tpu.memory_space<vmem>>, %arg4: memref<1x2x32xf32, #tpu.memory_space<vmem>>, %arg5: memref<4x32x32xbf16, #tpu.memory_space<vmem>>, %arg6: memref<4x32x32xbf16, #tpu.memory_space<vmem>>, %arg7: memref<4x1x32xf32, #tpu.memory_space<vmem>>, %arg8: memref<2x8x8xf32, #tpu.memory_space<vmem>>, %arg9: memref<32x2x32xf32, #tpu.memory_space<vmem>>, %arg10: memref<8x2x32xbf16, #tpu.memory_space<vmem>>) attributes {dimension_semantics = [], scalar_prefetch = 0 : i64, scratch_operands = 2 : i64, tpu.core_type = #tpu.core_type<tc>} {
    %c0 = arith.constant 0 : index
    %c0_0 = arith.constant 0 : index
    %0 = vector.load %arg1[%c0, %c0_0] : memref<16x32xbf16, #tpu.memory_space<vmem>>, vector<16x32xbf16>
    %c0_1 = arith.constant 0 : index
    %c0_2 = arith.constant 0 : index
    %c0_3 = arith.constant 0 : index
    %1 = vector.load %arg5[%c0_1, %c0_2, %c0_3] : memref<4x32x32xbf16, #tpu.memory_space<vmem>>, vector<1x32x32xbf16>
    %2 = vector.shape_cast %1 : vector<1x32x32xbf16> to vector<32x32xbf16>
    %cst = arith.constant dense<0.000000e+00> : vector<16x32xf32>
    %3 = tpu.matmul %0, %2, %cst {dimension_numbers = #tpu.dot_dimension_numbers<[1], [0], [0], [1], [0, 0, 1, 1], [], []>} : vector<16x32xbf16>, vector<32x32xbf16>, vector<16x32xf32> -> vector<16x32xf32>
    %c0_4 = arith.constant 0 : index
    %c0_5 = arith.constant 0 : index
    %c0_6 = arith.constant 0 : index
    %4 = vector.load %arg7[%c0_4, %c0_5, %c0_6] : memref<4x1x32xf32, #tpu.memory_space<vmem>>, vector<1x1x32xf32>
    %5 = vector.shape_cast %4 : vector<1x1x32xf32> to vector<1x32xf32>
    %6 = vector.broadcast %5 : vector<1x32xf32> to vector<16x32xf32>
    %7 = arith.addf %3, %6 : vector<16x32xf32>
    %8 = vector.shape_cast %7 : vector<16x32xf32> to vector<8x2x32xf32>
    %c0_7 = arith.constant 0 : index
    %c0_8 = arith.constant 0 : index
    %c0_9 = arith.constant 0 : index
    %9 = vector.load %arg9[%c0_7, %c0_8, %c0_9] : memref<32x2x32xf32, #tpu.memory_space<vmem>>, vector<8x2x32xf32>
    tpu.vector_store %arg9[%c0_7, %c0_8, %c0_9], %8 {strides = array<i32>} : memref<32x2x32xf32, #tpu.memory_space<vmem>>, vector<8x2x32xf32>,
    %c1 = arith.constant 1 : index
    %c0_10 = arith.constant 0 : index
    %c0_11 = arith.constant 0 : index
    %10 = vector.load %arg5[%c1, %c0_10, %c0_11] : memref<4x32x32xbf16, #tpu.memory_space<vmem>>, vector<1x32x32xbf16>
    %11 = vector.shape_cast %10 : vector<1x32x32xbf16> to vector<32x32xbf16>
    %cst_12 = arith.constant dense<0.000000e+00> : vector<16x32xf32>
    %12 = tpu.matmul %0, %11, %cst_12 {dimension_numbers = #tpu.dot_dimension_numbers<[1], [0], [0], [1], [0, 0, 1, 1], [], []>} : vector<16x32xbf16>, vector<32x32xbf16>, vector<16x32xf32> -> vector<16x32xf32>
    %c1_13 = arith.constant 1 : index
    %c0_14 = arith.constant 0 : index
    %c0_15 = arith.constant 0 : index
    %13 = vector.load %arg7[%c1_13, %c0_14, %c0_15] : memref<4x1x32xf32, #tpu.memory_space<vmem>>, vector<1x1x32xf32>
    %14 = vector.shape_cast %13 : vector<1x1x32xf32> to vector<1x32xf32>
    %15 = vector.broadcast %14 : vector<1x32xf32> to vector<16x32xf32>
    %16 = arith.addf %12, %15 : vector<16x32xf32>
    %17 = vector.shape_cast %16 : vector<16x32xf32> to vector<8x2x32xf32>
    %c8 = arith.constant 8 : index
    %c0_16 = arith.constant 0 : index
    %c0_17 = arith.constant 0 : index
    %18 = vector.load %arg9[%c8, %c0_16, %c0_17] : memref<32x2x32xf32, #tpu.memory_space<vmem>>, vector<8x2x32xf32>
    tpu.vector_store %arg9[%c8, %c0_16, %c0_17], %17 {strides = array<i32>} : memref<32x2x32xf32, #tpu.memory_space<vmem>>, vector<8x2x32xf32>,
    %c2 = arith.constant 2 : index
    %c0_18 = arith.constant 0 : index
    %c0_19 = arith.constant 0 : index
    %19 = vector.load %arg5[%c2, %c0_18, %c0_19] : memref<4x32x32xbf16, #tpu.memory_space<vmem>>, vector<1x32x32xbf16>
    %20 = vector.shape_cast %19 : vector<1x32x32xbf16> to vector<32x32xbf16>
    %cst_20 = arith.constant dense<0.000000e+00> : vector<16x32xf32>
    %21 = tpu.matmul %0, %20, %cst_20 {dimension_numbers = #tpu.dot_dimension_numbers<[1], [0], [0], [1], [0, 0, 1, 1], [], []>} : vector<16x32xbf16>, vector<32x32xbf16>, vector<16x32xf32> -> vector<16x32xf32>
    %c2_21 = arith.constant 2 : index
    %c0_22 = arith.constant 0 : index
    %c0_23 = arith.constant 0 : index
    %22 = vector.load %arg7[%c2_21, %c0_22, %c0_23] : memref<4x1x32xf32, #tpu.memory_space<vmem>>, vector<1x1x32xf32>
    %23 = vector.shape_cast %22 : vector<1x1x32xf32> to vector<1x32xf32>
    %24 = vector.broadcast %23 : vector<1x32xf32> to vector<16x32xf32>
    %25 = arith.addf %21, %24 : vector<16x32xf32>
    %26 = vector.shape_cast %25 : vector<16x32xf32> to vector<8x2x32xf32>
    %c16 = arith.constant 16 : index
    %c0_24 = arith.constant 0 : index
    %c0_25 = arith.constant 0 : index
    %27 = vector.load %arg9[%c16, %c0_24, %c0_25] : memref<32x2x32xf32, #tpu.memory_space<vmem>>, vector<8x2x32xf32>
    tpu.vector_store %arg9[%c16, %c0_24, %c0_25], %26 {strides = array<i32>} : memref<32x2x32xf32, #tpu.memory_space<vmem>>, vector<8x2x32xf32>,
    %c3 = arith.constant 3 : index
    %c0_26 = arith.constant 0 : index
    %c0_27 = arith.constant 0 : index
    %28 = vector.load %arg5[%c3, %c0_26, %c0_27] : memref<4x32x32xbf16, #tpu.memory_space<vmem>>, vector<1x32x32xbf16>
    %29 = vector.shape_cast %28 : vector<1x32x32xbf16> to vector<32x32xbf16>
    %cst_28 = arith.constant dense<0.000000e+00> : vector<16x32xf32>
    %30 = tpu.matmul %0, %29, %cst_28 {dimension_numbers = #tpu.dot_dimension_numbers<[1], [0], [0], [1], [0, 0, 1, 1], [], []>} : vector<16x32xbf16>, vector<32x32xbf16>, vector<16x32xf32> -> vector<16x32xf32>
    %c3_29 = arith.constant 3 : index
    %c0_30 = arith.constant 0 : index
    %c0_31 = arith.constant 0 : index
    %31 = vector.load %arg7[%c3_29, %c0_30, %c0_31] : memref<4x1x32xf32, #tpu.memory_space<vmem>>, vector<1x1x32xf32>
    %32 = vector.shape_cast %31 : vector<1x1x32xf32> to vector<1x32xf32>
    %33 = vector.broadcast %32 : vector<1x32xf32> to vector<16x32xf32>
    %34 = arith.addf %30, %33 : vector<16x32xf32>
    %35 = vector.shape_cast %34 : vector<16x32xf32> to vector<8x2x32xf32>
    %c24 = arith.constant 24 : index
    %c0_32 = arith.constant 0 : index
    %c0_33 = arith.constant 0 : index
    %36 = vector.load %arg9[%c24, %c0_32, %c0_33] : memref<32x2x32xf32, #tpu.memory_space<vmem>>, vector<8x2x32xf32>
    tpu.vector_store %arg9[%c24, %c0_32, %c0_33], %35 {strides = array<i32>} : memref<32x2x32xf32, #tpu.memory_space<vmem>>, vector<8x2x32xf32>,
    %c0_34 = arith.constant 0 : index
    %c0_35 = arith.constant 0 : index
    %c0_36 = arith.constant 0 : index
    %37 = vector.load %arg6[%c0_34, %c0_35, %c0_36] : memref<4x32x32xbf16, #tpu.memory_space<vmem>>, vector<1x32x32xbf16>
    %38 = vector.shape_cast %37 : vector<1x32x32xbf16> to vector<32x32xbf16>
    %c1_37 = arith.constant 1 : index
    %c0_38 = arith.constant 0 : index
    %c0_39 = arith.constant 0 : index
    %39 = vector.load %arg6[%c1_37, %c0_38, %c0_39] : memref<4x32x32xbf16, #tpu.memory_space<vmem>>, vector<1x32x32xbf16>
    %40 = vector.shape_cast %39 : vector<1x32x32xbf16> to vector<32x32xbf16>
    %c2_40 = arith.constant 2 : index
    %c0_41 = arith.constant 0 : index
    %c0_42 = arith.constant 0 : index
    %41 = vector.load %arg6[%c2_40, %c0_41, %c0_42] : memref<4x32x32xbf16, #tpu.memory_space<vmem>>, vector<1x32x32xbf16>
    %42 = vector.shape_cast %41 : vector<1x32x32xbf16> to vector<32x32xbf16>
    %c3_43 = arith.constant 3 : index
    %c0_44 = arith.constant 0 : index
    %c0_45 = arith.constant 0 : index
    %43 = vector.load %arg6[%c3_43, %c0_44, %c0_45] : memref<4x32x32xbf16, #tpu.memory_space<vmem>>, vector<1x32x32xbf16>
    %44 = vector.shape_cast %43 : vector<1x32x32xbf16> to vector<32x32xbf16>
    %c0_46 = arith.constant 0 : index
    %c0_47 = arith.constant 0 : index
    %c0_48 = arith.constant 0 : index
    %45 = vector.load %arg3[%c0_46, %c0_47, %c0_48] : memref<1x2x32xf32, #tpu.memory_space<vmem>>, vector<1x2x32xf32>
    %46 = vector.shape_cast %45 : vector<1x2x32xf32> to vector<2x32xf32>
    %c0_49 = arith.constant 0 : index
    %c0_50 = arith.constant 0 : index
    %c0_51 = arith.constant 0 : index
    %47 = vector.load %arg4[%c0_49, %c0_50, %c0_51] : memref<1x2x32xf32, #tpu.memory_space<vmem>>, vector<1x2x32xf32>
    %48 = vector.shape_cast %47 : vector<1x2x32xf32> to vector<2x32xf32>
    %c0_i32 = arith.constant 0 : i32
    %49 = arith.truncf %46 : vector<2x32xf32> to vector<2x32xbf16>
    %c0_i32_52 = arith.constant 0 : i32
    %50 = arith.addi %c0_i32_52, %c0_i32 : i32
    %51 = arith.index_cast %50 : i32 to index
    %c0_53 = arith.constant 0 : index
    %c0_54 = arith.constant 0 : index
    %52 = vector.load %arg9[%51, %c0_53, %c0_54] : memref<32x2x32xf32, #tpu.memory_space<vmem>>, vector<1x2x32xf32>
    %53 = vector.shape_cast %52 : vector<1x2x32xf32> to vector<2x32xf32>
    %cst_55 = arith.constant dense<0.000000e+00> : vector<2x32xf32>
    %54 = tpu.matmul %49, %38, %cst_55 {dimension_numbers = #tpu.dot_dimension_numbers<[1], [0], [0], [1], [0, 0, 1, 1], [], []>} : vector<2x32xbf16>, vector<32x32xbf16>, vector<2x32xf32> -> vector<2x32xf32>
    %55 = arith.addf %53, %54 : vector<2x32xf32>
    %56 = arith.negf %55 : vector<2x32xf32>
    %57 = math.exp %56 : vector<2x32xf32>
    %cst_56 = arith.constant 1.000000e+00 : f32
    %58 = vector.broadcast %cst_56 : f32 to vector<2x32xf32>
    %59 = arith.addf %58, %57 : vector<2x32xf32>
    %60 = arith.divf %58, %59 : vector<2x32xf32>
    %c8_i32 = arith.constant 8 : i32
    %61 = arith.addi %c8_i32, %c0_i32 : i32
    %62 = arith.index_cast %61 : i32 to index
    %c0_57 = arith.constant 0 : index
    %c0_58 = arith.constant 0 : index
    %63 = vector.load %arg9[%62, %c0_57, %c0_58] : memref<32x2x32xf32, #tpu.memory_space<vmem>>, vector<1x2x32xf32>
    %64 = vector.shape_cast %63 : vector<1x2x32xf32> to vector<2x32xf32>
    %cst_59 = arith.constant dense<0.000000e+00> : vector<2x32xf32>
    %65 = tpu.matmul %49, %40, %cst_59 {dimension_numbers = #tpu.dot_dimension_numbers<[1], [0], [0], [1], [0, 0, 1, 1], [], []>} : vector<2x32xbf16>, vector<32x32xbf16>, vector<2x32xf32> -> vector<2x32xf32>
    %66 = arith.addf %64, %65 : vector<2x32xf32>
    %67 = arith.negf %66 : vector<2x32xf32>
    %68 = math.exp %67 : vector<2x32xf32>
    %cst_60 = arith.constant 1.000000e+00 : f32
    %69 = vector.broadcast %cst_60 : f32 to vector<2x32xf32>
    %70 = arith.addf %69, %68 : vector<2x32xf32>
    %71 = arith.divf %69, %70 : vector<2x32xf32>
    %c16_i32 = arith.constant 16 : i32
    %72 = arith.addi %c16_i32, %c0_i32 : i32
    %73 = arith.index_cast %72 : i32 to index
    %c0_61 = arith.constant 0 : index
    %c0_62 = arith.constant 0 : index
    %74 = vector.load %arg9[%73, %c0_61, %c0_62] : memref<32x2x32xf32, #tpu.memory_space<vmem>>, vector<1x2x32xf32>
    %75 = vector.shape_cast %74 : vector<1x2x32xf32> to vector<2x32xf32>
    %cst_63 = arith.constant dense<0.000000e+00> : vector<2x32xf32>
    %76 = tpu.matmul %49, %42, %cst_63 {dimension_numbers = #tpu.dot_dimension_numbers<[1], [0], [0], [1], [0, 0, 1, 1], [], []>} : vector<2x32xbf16>, vector<32x32xbf16>, vector<2x32xf32> -> vector<2x32xf32>
    %77 = arith.addf %75, %76 : vector<2x32xf32>
    %78 = math.tanh %77 : vector<2x32xf32>
    %c24_i32 = arith.constant 24 : i32
    %79 = arith.addi %c24_i32, %c0_i32 : i32
    %80 = arith.index_cast %79 : i32 to index
    %c0_64 = arith.constant 0 : index
    %c0_65 = arith.constant 0 : index
    %81 = vector.load %arg9[%80, %c0_64, %c0_65] : memref<32x2x32xf32, #tpu.memory_space<vmem>>, vector<1x2x32xf32>
    %82 = vector.shape_cast %81 : vector<1x2x32xf32> to vector<2x32xf32>
    %cst_66 = arith.constant dense<0.000000e+00> : vector<2x32xf32>
    %83 = tpu.matmul %49, %44, %cst_66 {dimension_numbers = #tpu.dot_dimension_numbers<[1], [0], [0], [1], [0, 0, 1, 1], [], []>} : vector<2x32xbf16>, vector<32x32xbf16>, vector<2x32xf32> -> vector<2x32xf32>
    %84 = arith.addf %82, %83 : vector<2x32xf32>
    %85 = arith.negf %84 : vector<2x32xf32>
    %86 = math.exp %85 : vector<2x32xf32>
    %cst_67 = arith.constant 1.000000e+00 : f32
    %87 = vector.broadcast %cst_67 : f32 to vector<2x32xf32>
    %88 = arith.addf %87, %86 : vector<2x32xf32>
    %89 = arith.divf %87, %88 : vector<2x32xf32>
    %90 = arith.mulf %71, %48 : vector<2x32xf32>
    %91 = arith.mulf %60, %78 : vector<2x32xf32>
    %92 = arith.addf %90, %91 : vector<2x32xf32>
    %93 = math.tanh %92 : vector<2x32xf32>
    %94 = arith.mulf %89, %93 : vector<2x32xf32>
    %95 = arith.truncf %94 : vector<2x32xf32> to vector<2x32xbf16>
    %96 = arith.index_cast %c0_i32 : i32 to index
    %c0_68 = arith.constant 0 : index
    %c0_69 = arith.constant 0 : index
    %97 = vector.load %arg10[%96, %c0_68, %c0_69] : memref<8x2x32xbf16, #tpu.memory_space<vmem>>, vector<1x2x32xbf16>
    %98 = vector.shape_cast %97 : vector<1x2x32xbf16> to vector<2x32xbf16>
    %99 = vector.shape_cast %95 : vector<2x32xbf16> to vector<1x2x32xbf16>
    tpu.vector_store %arg10[%96, %c0_68, %c0_69], %99 {strides = array<i32>} : memref<8x2x32xbf16, #tpu.memory_space<vmem>>, vector<1x2x32xbf16>,
    %c1_i32 = arith.constant 1 : i32
    %100 = arith.truncf %94 : vector<2x32xf32> to vector<2x32xbf16>
    %c0_i32_70 = arith.constant 0 : i32
    %101 = arith.addi %c0_i32_70, %c1_i32 : i32
    %102 = arith.index_cast %101 : i32 to index
    %c0_71 = arith.constant 0 : index
    %c0_72 = arith.constant 0 : index
    %103 = vector.load %arg9[%102, %c0_71, %c0_72] : memref<32x2x32xf32, #tpu.memory_space<vmem>>, vector<1x2x32xf32>
    %104 = vector.shape_cast %103 : vector<1x2x32xf32> to vector<2x32xf32>
    %cst_73 = arith.constant dense<0.000000e+00> : vector<2x32xf32>
    %105 = tpu.matmul %100, %38, %cst_73 {dimension_numbers = #tpu.dot_dimension_numbers<[1], [0], [0], [1], [0, 0, 1, 1], [], []>} : vector<2x32xbf16>, vector<32x32xbf16>, vector<2x32xf32> -> vector<2x32xf32>
    %106 = arith.addf %104, %105 : vector<2x32xf32>
    %107 = arith.negf %106 : vector<2x32xf32>
    %108 = math.exp %107 : vector<2x32xf32>
    %cst_74 = arith.constant 1.000000e+00 : f32
    %109 = vector.broadcast %cst_74 : f32 to vector<2x32xf32>
    %110 = arith.addf %109, %108 : vector<2x32xf32>
    %111 = arith.divf %109, %110 : vector<2x32xf32>
    %c8_i32_75 = arith.constant 8 : i32
    %112 = arith.addi %c8_i32_75, %c1_i32 : i32
    %113 = arith.index_cast %112 : i32 to index
    %c0_76 = arith.constant 0 : index
    %c0_77 = arith.constant 0 : index
    %114 = vector.load %arg9[%113, %c0_76, %c0_77] : memref<32x2x32xf32, #tpu.memory_space<vmem>>, vector<1x2x32xf32>
    %115 = vector.shape_cast %114 : vector<1x2x32xf32> to vector<2x32xf32>
    %cst_78 = arith.constant dense<0.000000e+00> : vector<2x32xf32>
    %116 = tpu.matmul %100, %40, %cst_78 {dimension_numbers = #tpu.dot_dimension_numbers<[1], [0], [0], [1], [0, 0, 1, 1], [], []>} : vector<2x32xbf16>, vector<32x32xbf16>, vector<2x32xf32> -> vector<2x32xf32>
    %117 = arith.addf %115, %116 : vector<2x32xf32>
    %118 = arith.negf %117 : vector<2x32xf32>
    %119 = math.exp %118 : vector<2x32xf32>
    %cst_79 = arith.constant 1.000000e+00 : f32
    %120 = vector.broadcast %cst_79 : f32 to vector<2x32xf32>
    %121 = arith.addf %120, %119 : vector<2x32xf32>
    %122 = arith.divf %120, %121 : vector<2x32xf32>
    %c16_i32_80 = arith.constant 16 : i32
    %123 = arith.addi %c16_i32_80, %c1_i32 : i32
    %124 = arith.index_cast %123 : i32 to index
    %c0_81 = arith.constant 0 : index
    %c0_82 = arith.constant 0 : index
    %125 = vector.load %arg9[%124, %c0_81, %c0_82] : memref<32x2x32xf32, #tpu.memory_space<vmem>>, vector<1x2x32xf32>
    %126 = vector.shape_cast %125 : vector<1x2x32xf32> to vector<2x32xf32>
    %cst_83 = arith.constant dense<0.000000e+00> : vector<2x32xf32>
    %127 = tpu.matmul %100, %42, %cst_83 {dimension_numbers = #tpu.dot_dimension_numbers<[1], [0], [0], [1], [0, 0, 1, 1], [], []>} : vector<2x32xbf16>, vector<32x32xbf16>, vector<2x32xf32> -> vector<2x32xf32>
    %128 = arith.addf %126, %127 : vector<2x32xf32>
    %129 = math.tanh %128 : vector<2x32xf32>
    %c24_i32_84 = arith.constant 24 : i32
    %130 = arith.addi %c24_i32_84, %c1_i32 : i32
    %131 = arith.index_cast %130 : i32 to index
    %c0_85 = arith.constant 0 : index
    %c0_86 = arith.constant 0 : index
    %132 = vector.load %arg9[%131, %c0_85, %c0_86] : memref<32x2x32xf32, #tpu.memory_space<vmem>>, vector<1x2x32xf32>
    %133 = vector.shape_cast %132 : vector<1x2x32xf32> to vector<2x32xf32>
    %cst_87 = arith.constant dense<0.000000e+00> : vector<2x32xf32>
    %134 = tpu.matmul %100, %44, %cst_87 {dimension_numbers = #tpu.dot_dimension_numbers<[1], [0], [0], [1], [0, 0, 1, 1], [], []>} : vector<2x32xbf16>, vector<32x32xbf16>, vector<2x32xf32> -> vector<2x32xf32>
    %135 = arith.addf %133, %134 : vector<2x32xf32>
    %136 = arith.negf %135 : vector<2x32xf32>
    %137 = math.exp %136 : vector<2x32xf32>
    %cst_88 = arith.constant 1.000000e+00 : f32
    %138 = vector.broadcast %cst_88 : f32 to vector<2x32xf32>
    %139 = arith.addf %138, %137 : vector<2x32xf32>
    %140 = arith.divf %138, %139 : vector<2x32xf32>
    %141 = arith.mulf %122, %92 : vector<2x32xf32>
    %142 = arith.mulf %111, %129 : vector<2x32xf32>
    %143 = arith.addf %141, %142 : vector<2x32xf32>
    %144 = math.tanh %143 : vector<2x32xf32>
    %145 = arith.mulf %140, %144 : vector<2x32xf32>
    %146 = arith.truncf %145 : vector<2x32xf32> to vector<2x32xbf16>
    %147 = arith.index_cast %c1_i32 : i32 to index
    %c0_89 = arith.constant 0 : index
    %c0_90 = arith.constant 0 : index
    %148 = vector.load %arg10[%147, %c0_89, %c0_90] : memref<8x2x32xbf16, #tpu.memory_space<vmem>>, vector<1x2x32xbf16>
    %149 = vector.shape_cast %148 : vector<1x2x32xbf16> to vector<2x32xbf16>
    %150 = vector.shape_cast %146 : vector<2x32xbf16> to vector<1x2x32xbf16>
    tpu.vector_store %arg10[%147, %c0_89, %c0_90], %150 {strides = array<i32>} : memref<8x2x32xbf16, #tpu.memory_space<vmem>>, vector<1x2x32xbf16>,
    %c2_i32 = arith.constant 2 : i32
    %151 = arith.truncf %145 : vector<2x32xf32> to vector<2x32xbf16>
    %c0_i32_91 = arith.constant 0 : i32
    %152 = arith.addi %c0_i32_91, %c2_i32 : i32
    %153 = arith.index_cast %152 : i32 to index
    %c0_92 = arith.constant 0 : index
    %c0_93 = arith.constant 0 : index
    %154 = vector.load %arg9[%153, %c0_92, %c0_93] : memref<32x2x32xf32, #tpu.memory_space<vmem>>, vector<1x2x32xf32>
    %155 = vector.shape_cast %154 : vector<1x2x32xf32> to vector<2x32xf32>
    %cst_94 = arith.constant dense<0.000000e+00> : vector<2x32xf32>
    %156 = tpu.matmul %151, %38, %cst_94 {dimension_numbers = #tpu.dot_dimension_numbers<[1], [0], [0], [1], [0, 0, 1, 1], [], []>} : vector<2x32xbf16>, vector<32x32xbf16>, vector<2x32xf32> -> vector<2x32xf32>
    %157 = arith.addf %155, %156 : vector<2x32xf32>
    %158 = arith.negf %157 : vector<2x32xf32>
    %159 = math.exp %158 : vector<2x32xf32>
    %cst_95 = arith.constant 1.000000e+00 : f32
    %160 = vector.broadcast %cst_95 : f32 to vector<2x32xf32>
    %161 = arith.addf %160, %159 : vector<2x32xf32>
    %162 = arith.divf %160, %161 : vector<2x32xf32>
    %c8_i32_96 = arith.constant 8 : i32
    %163 = arith.addi %c8_i32_96, %c2_i32 : i32
    %164 = arith.index_cast %163 : i32 to index
    %c0_97 = arith.constant 0 : index
    %c0_98 = arith.constant 0 : index
    %165 = vector.load %arg9[%164, %c0_97, %c0_98] : memref<32x2x32xf32, #tpu.memory_space<vmem>>, vector<1x2x32xf32>
    %166 = vector.shape_cast %165 : vector<1x2x32xf32> to vector<2x32xf32>
    %cst_99 = arith.constant dense<0.000000e+00> : vector<2x32xf32>
    %167 = tpu.matmul %151, %40, %cst_99 {dimension_numbers = #tpu.dot_dimension_numbers<[1], [0], [0], [1], [0, 0, 1, 1], [], []>} : vector<2x32xbf16>, vector<32x32xbf16>, vector<2x32xf32> -> vector<2x32xf32>
    %168 = arith.addf %166, %167 : vector<2x32xf32>
    %169 = arith.negf %168 : vector<2x32xf32>
    %170 = math.exp %169 : vector<2x32xf32>
    %cst_100 = arith.constant 1.000000e+00 : f32
    %171 = vector.broadcast %cst_100 : f32 to vector<2x32xf32>
    %172 = arith.addf %171, %170 : vector<2x32xf32>
    %173 = arith.divf %171, %172 : vector<2x32xf32>
    %c16_i32_101 = arith.constant 16 : i32
    %174 = arith.addi %c16_i32_101, %c2_i32 : i32
    %175 = arith.index_cast %174 : i32 to index
    %c0_102 = arith.constant 0 : index
    %c0_103 = arith.constant 0 : index
    %176 = vector.load %arg9[%175, %c0_102, %c0_103] : memref<32x2x32xf32, #tpu.memory_space<vmem>>, vector<1x2x32xf32>
    %177 = vector.shape_cast %176 : vector<1x2x32xf32> to vector<2x32xf32>
    %cst_104 = arith.constant dense<0.000000e+00> : vector<2x32xf32>
    %178 = tpu.matmul %151, %42, %cst_104 {dimension_numbers = #tpu.dot_dimension_numbers<[1], [0], [0], [1], [0, 0, 1, 1], [], []>} : vector<2x32xbf16>, vector<32x32xbf16>, vector<2x32xf32> -> vector<2x32xf32>
    %179 = arith.addf %177, %178 : vector<2x32xf32>
    %180 = math.tanh %179 : vector<2x32xf32>
    %c24_i32_105 = arith.constant 24 : i32
    %181 = arith.addi %c24_i32_105, %c2_i32 : i32
    %182 = arith.index_cast %181 : i32 to index
    %c0_106 = arith.constant 0 : index
    %c0_107 = arith.constant 0 : index
    %183 = vector.load %arg9[%182, %c0_106, %c0_107] : memref<32x2x32xf32, #tpu.memory_space<vmem>>, vector<1x2x32xf32>
    %184 = vector.shape_cast %183 : vector<1x2x32xf32> to vector<2x32xf32>
    %cst_108 = arith.constant dense<0.000000e+00> : vector<2x32xf32>
    %185 = tpu.matmul %151, %44, %cst_108 {dimension_numbers = #tpu.dot_dimension_numbers<[1], [0], [0], [1], [0, 0, 1, 1], [], []>} : vector<2x32xbf16>, vector<32x32xbf16>, vector<2x32xf32> -> vector<2x32xf32>
    %186 = arith.addf %184, %185 : vector<2x32xf32>
    %187 = arith.negf %186 : vector<2x32xf32>
    %188 = math.exp %187 : vector<2x32xf32>
    %cst_109 = arith.constant 1.000000e+00 : f32
    %189 = vector.broadcast %cst_109 : f32 to vector<2x32xf32>
    %190 = arith.addf %189, %188 : vector<2x32xf32>
    %191 = arith.divf %189, %190 : vector<2x32xf32>
    %192 = arith.mulf %173, %143 : vector<2x32xf32>
    %193 = arith.mulf %162, %180 : vector<2x32xf32>
    %194 = arith.addf %192, %193 : vector<2x32xf32>
    %195 = math.tanh %194 : vector<2x32xf32>
    %196 = arith.mulf %191, %195 : vector<2x32xf32>
    %197 = arith.truncf %196 : vector<2x32xf32> to vector<2x32xbf16>
    %198 = arith.index_cast %c2_i32 : i32 to index
    %c0_110 = arith.constant 0 : index
    %c0_111 = arith.constant 0 : index
    %199 = vector.load %arg10[%198, %c0_110, %c0_111] : memref<8x2x32xbf16, #tpu.memory_space<vmem>>, vector<1x2x32xbf16>
    %200 = vector.shape_cast %199 : vector<1x2x32xbf16> to vector<2x32xbf16>
    %201 = vector.shape_cast %197 : vector<2x32xbf16> to vector<1x2x32xbf16>
    tpu.vector_store %arg10[%198, %c0_110, %c0_111], %201 {strides = array<i32>} : memref<8x2x32xbf16, #tpu.memory_space<vmem>>, vector<1x2x32xbf16>,
    %c3_i32 = arith.constant 3 : i32
    %202 = arith.truncf %196 : vector<2x32xf32> to vector<2x32xbf16>
    %c0_i32_112 = arith.constant 0 : i32
    %203 = arith.addi %c0_i32_112, %c3_i32 : i32
    %204 = arith.index_cast %203 : i32 to index
    %c0_113 = arith.constant 0 : index
    %c0_114 = arith.constant 0 : index
    %205 = vector.load %arg9[%204, %c0_113, %c0_114] : memref<32x2x32xf32, #tpu.memory_space<vmem>>, vector<1x2x32xf32>
    %206 = vector.shape_cast %205 : vector<1x2x32xf32> to vector<2x32xf32>
    %cst_115 = arith.constant dense<0.000000e+00> : vector<2x32xf32>
    %207 = tpu.matmul %202, %38, %cst_115 {dimension_numbers = #tpu.dot_dimension_numbers<[1], [0], [0], [1], [0, 0, 1, 1], [], []>} : vector<2x32xbf16>, vector<32x32xbf16>, vector<2x32xf32> -> vector<2x32xf32>
    %208 = arith.addf %206, %207 : vector<2x32xf32>
    %209 = arith.negf %208 : vector<2x32xf32>
    %210 = math.exp %209 : vector<2x32xf32>
    %cst_116 = arith.constant 1.000000e+00 : f32
    %211 = vector.broadcast %cst_116 : f32 to vector<2x32xf32>
    %212 = arith.addf %211, %210 : vector<2x32xf32>
    %213 = arith.divf %211, %212 : vector<2x32xf32>
    %c8_i32_117 = arith.constant 8 : i32
    %214 = arith.addi %c8_i32_117, %c3_i32 : i32
    %215 = arith.index_cast %214 : i32 to index
    %c0_118 = arith.constant 0 : index
    %c0_119 = arith.constant 0 : index
    %216 = vector.load %arg9[%215, %c0_118, %c0_119] : memref<32x2x32xf32, #tpu.memory_space<vmem>>, vector<1x2x32xf32>
    %217 = vector.shape_cast %216 : vector<1x2x32xf32> to vector<2x32xf32>
    %cst_120 = arith.constant dense<0.000000e+00> : vector<2x32xf32>
    %218 = tpu.matmul %202, %40, %cst_120 {dimension_numbers = #tpu.dot_dimension_numbers<[1], [0], [0], [1], [0, 0, 1, 1], [], []>} : vector<2x32xbf16>, vector<32x32xbf16>, vector<2x32xf32> -> vector<2x32xf32>
    %219 = arith.addf %217, %218 : vector<2x32xf32>
    %220 = arith.negf %219 : vector<2x32xf32>
    %221 = math.exp %220 : vector<2x32xf32>
    %cst_121 = arith.constant 1.000000e+00 : f32
    %222 = vector.broadcast %cst_121 : f32 to vector<2x32xf32>
    %223 = arith.addf %222, %221 : vector<2x32xf32>
    %224 = arith.divf %222, %223 : vector<2x32xf32>
    %c16_i32_122 = arith.constant 16 : i32
    %225 = arith.addi %c16_i32_122, %c3_i32 : i32
    %226 = arith.index_cast %225 : i32 to index
    %c0_123 = arith.constant 0 : index
    %c0_124 = arith.constant 0 : index
    %227 = vector.load %arg9[%226, %c0_123, %c0_124] : memref<32x2x32xf32, #tpu.memory_space<vmem>>, vector<1x2x32xf32>
    %228 = vector.shape_cast %227 : vector<1x2x32xf32> to vector<2x32xf32>
    %cst_125 = arith.constant dense<0.000000e+00> : vector<2x32xf32>
    %229 = tpu.matmul %202, %42, %cst_125 {dimension_numbers = #tpu.dot_dimension_numbers<[1], [0], [0], [1], [0, 0, 1, 1], [], []>} : vector<2x32xbf16>, vector<32x32xbf16>, vector<2x32xf32> -> vector<2x32xf32>
    %230 = arith.addf %228, %229 : vector<2x32xf32>
    %231 = math.tanh %230 : vector<2x32xf32>
    %c24_i32_126 = arith.constant 24 : i32
    %232 = arith.addi %c24_i32_126, %c3_i32 : i32
    %233 = arith.index_cast %232 : i32 to index
    %c0_127 = arith.constant 0 : index
    %c0_128 = arith.constant 0 : index
    %234 = vector.load %arg9[%233, %c0_127, %c0_128] : memref<32x2x32xf32, #tpu.memory_space<vmem>>, vector<1x2x32xf32>
    %235 = vector.shape_cast %234 : vector<1x2x32xf32> to vector<2x32xf32>
    %cst_129 = arith.constant dense<0.000000e+00> : vector<2x32xf32>
    %236 = tpu.matmul %202, %44, %cst_129 {dimension_numbers = #tpu.dot_dimension_numbers<[1], [0], [0], [1], [0, 0, 1, 1], [], []>} : vector<2x32xbf16>, vector<32x32xbf16>, vector<2x32xf32> -> vector<2x32xf32>
    %237 = arith.addf %235, %236 : vector<2x32xf32>
    %238 = arith.negf %237 : vector<2x32xf32>
    %239 = math.exp %238 : vector<2x32xf32>
    %cst_130 = arith.constant 1.000000e+00 : f32
    %240 = vector.broadcast %cst_130 : f32 to vector<2x32xf32>
    %241 = arith.addf %240, %239 : vector<2x32xf32>
    %242 = arith.divf %240, %241 : vector<2x32xf32>
    %243 = arith.mulf %224, %194 : vector<2x32xf32>
    %244 = arith.mulf %213, %231 : vector<2x32xf32>
    %245 = arith.addf %243, %244 : vector<2x32xf32>
    %246 = math.tanh %245 : vector<2x32xf32>
    %247 = arith.mulf %242, %246 : vector<2x32xf32>
    %248 = arith.truncf %247 : vector<2x32xf32> to vector<2x32xbf16>
    %249 = arith.index_cast %c3_i32 : i32 to index
    %c0_131 = arith.constant 0 : index
    %c0_132 = arith.constant 0 : index
    %250 = vector.load %arg10[%249, %c0_131, %c0_132] : memref<8x2x32xbf16, #tpu.memory_space<vmem>>, vector<1x2x32xbf16>
    %251 = vector.shape_cast %250 : vector<1x2x32xbf16> to vector<2x32xbf16>
    %252 = vector.shape_cast %248 : vector<2x32xbf16> to vector<1x2x32xbf16>
    tpu.vector_store %arg10[%249, %c0_131, %c0_132], %252 {strides = array<i32>} : memref<8x2x32xbf16, #tpu.memory_space<vmem>>, vector<1x2x32xbf16>,
    %c4_i32 = arith.constant 4 : i32
    %253 = arith.truncf %247 : vector<2x32xf32> to vector<2x32xbf16>
    %c0_i32_133 = arith.constant 0 : i32
    %254 = arith.addi %c0_i32_133, %c4_i32 : i32
    %255 = arith.index_cast %254 : i32 to index
    %c0_134 = arith.constant 0 : index
    %c0_135 = arith.constant 0 : index
    %256 = vector.load %arg9[%255, %c0_134, %c0_135] : memref<32x2x32xf32, #tpu.memory_space<vmem>>, vector<1x2x32xf32>
    %257 = vector.shape_cast %256 : vector<1x2x32xf32> to vector<2x32xf32>
    %cst_136 = arith.constant dense<0.000000e+00> : vector<2x32xf32>
    %258 = tpu.matmul %253, %38, %cst_136 {dimension_numbers = #tpu.dot_dimension_numbers<[1], [0], [0], [1], [0, 0, 1, 1], [], []>} : vector<2x32xbf16>, vector<32x32xbf16>, vector<2x32xf32> -> vector<2x32xf32>
    %259 = arith.addf %257, %258 : vector<2x32xf32>
    %260 = arith.negf %259 : vector<2x32xf32>
    %261 = math.exp %260 : vector<2x32xf32>
    %cst_137 = arith.constant 1.000000e+00 : f32
    %262 = vector.broadcast %cst_137 : f32 to vector<2x32xf32>
    %263 = arith.addf %262, %261 : vector<2x32xf32>
    %264 = arith.divf %262, %263 : vector<2x32xf32>
    %c8_i32_138 = arith.constant 8 : i32
    %265 = arith.addi %c8_i32_138, %c4_i32 : i32
    %266 = arith.index_cast %265 : i32 to index
    %c0_139 = arith.constant 0 : index
    %c0_140 = arith.constant 0 : index
    %267 = vector.load %arg9[%266, %c0_139, %c0_140] : memref<32x2x32xf32, #tpu.memory_space<vmem>>, vector<1x2x32xf32>
    %268 = vector.shape_cast %267 : vector<1x2x32xf32> to vector<2x32xf32>
    %cst_141 = arith.constant dense<0.000000e+00> : vector<2x32xf32>
    %269 = tpu.matmul %253, %40, %cst_141 {dimension_numbers = #tpu.dot_dimension_numbers<[1], [0], [0], [1], [0, 0, 1, 1], [], []>} : vector<2x32xbf16>, vector<32x32xbf16>, vector<2x32xf32> -> vector<2x32xf32>
    %270 = arith.addf %268, %269 : vector<2x32xf32>
    %271 = arith.negf %270 : vector<2x32xf32>
    %272 = math.exp %271 : vector<2x32xf32>
    %cst_142 = arith.constant 1.000000e+00 : f32
    %273 = vector.broadcast %cst_142 : f32 to vector<2x32xf32>
    %274 = arith.addf %273, %272 : vector<2x32xf32>
    %275 = arith.divf %273, %274 : vector<2x32xf32>
    %c16_i32_143 = arith.constant 16 : i32
    %276 = arith.addi %c16_i32_143, %c4_i32 : i32
    %277 = arith.index_cast %276 : i32 to index
    %c0_144 = arith.constant 0 : index
    %c0_145 = arith.constant 0 : index
    %278 = vector.load %arg9[%277, %c0_144, %c0_145] : memref<32x2x32xf32, #tpu.memory_space<vmem>>, vector<1x2x32xf32>
    %279 = vector.shape_cast %278 : vector<1x2x32xf32> to vector<2x32xf32>
    %cst_146 = arith.constant dense<0.000000e+00> : vector<2x32xf32>
    %280 = tpu.matmul %253, %42, %cst_146 {dimension_numbers = #tpu.dot_dimension_numbers<[1], [0], [0], [1], [0, 0, 1, 1], [], []>} : vector<2x32xbf16>, vector<32x32xbf16>, vector<2x32xf32> -> vector<2x32xf32>
    %281 = arith.addf %279, %280 : vector<2x32xf32>
    %282 = math.tanh %281 : vector<2x32xf32>
    %c24_i32_147 = arith.constant 24 : i32
    %283 = arith.addi %c24_i32_147, %c4_i32 : i32
    %284 = arith.index_cast %283 : i32 to index
    %c0_148 = arith.constant 0 : index
    %c0_149 = arith.constant 0 : index
    %285 = vector.load %arg9[%284, %c0_148, %c0_149] : memref<32x2x32xf32, #tpu.memory_space<vmem>>, vector<1x2x32xf32>
    %286 = vector.shape_cast %285 : vector<1x2x32xf32> to vector<2x32xf32>
    %cst_150 = arith.constant dense<0.000000e+00> : vector<2x32xf32>
    %287 = tpu.matmul %253, %44, %cst_150 {dimension_numbers = #tpu.dot_dimension_numbers<[1], [0], [0], [1], [0, 0, 1, 1], [], []>} : vector<2x32xbf16>, vector<32x32xbf16>, vector<2x32xf32> -> vector<2x32xf32>
    %288 = arith.addf %286, %287 : vector<2x32xf32>
    %289 = arith.negf %288 : vector<2x32xf32>
    %290 = math.exp %289 : vector<2x32xf32>
    %cst_151 = arith.constant 1.000000e+00 : f32
    %291 = vector.broadcast %cst_151 : f32 to vector<2x32xf32>
    %292 = arith.addf %291, %290 : vector<2x32xf32>
    %293 = arith.divf %291, %292 : vector<2x32xf32>
    %294 = arith.mulf %275, %245 : vector<2x32xf32>
    %295 = arith.mulf %264, %282 : vector<2x32xf32>
    %296 = arith.addf %294, %295 : vector<2x32xf32>
    %297 = math.tanh %296 : vector<2x32xf32>
    %298 = arith.mulf %293, %297 : vector<2x32xf32>
    %299 = arith.truncf %298 : vector<2x32xf32> to vector<2x32xbf16>
    %300 = arith.index_cast %c4_i32 : i32 to index
    %c0_152 = arith.constant 0 : index
    %c0_153 = arith.constant 0 : index
    %301 = vector.load %arg10[%300, %c0_152, %c0_153] : memref<8x2x32xbf16, #tpu.memory_space<vmem>>, vector<1x2x32xbf16>
    %302 = vector.shape_cast %301 : vector<1x2x32xbf16> to vector<2x32xbf16>
    %303 = vector.shape_cast %299 : vector<2x32xbf16> to vector<1x2x32xbf16>
    tpu.vector_store %arg10[%300, %c0_152, %c0_153], %303 {strides = array<i32>} : memref<8x2x32xbf16, #tpu.memory_space<vmem>>, vector<1x2x32xbf16>,
    %c5_i32 = arith.constant 5 : i32
    %304 = arith.truncf %298 : vector<2x32xf32> to vector<2x32xbf16>
    %c0_i32_154 = arith.constant 0 : i32
    %305 = arith.addi %c0_i32_154, %c5_i32 : i32
    %306 = arith.index_cast %305 : i32 to index
    %c0_155 = arith.constant 0 : index
    %c0_156 = arith.constant 0 : index
    %307 = vector.load %arg9[%306, %c0_155, %c0_156] : memref<32x2x32xf32, #tpu.memory_space<vmem>>, vector<1x2x32xf32>
    %308 = vector.shape_cast %307 : vector<1x2x32xf32> to vector<2x32xf32>
    %cst_157 = arith.constant dense<0.000000e+00> : vector<2x32xf32>
    %309 = tpu.matmul %304, %38, %cst_157 {dimension_numbers = #tpu.dot_dimension_numbers<[1], [0], [0], [1], [0, 0, 1, 1], [], []>} : vector<2x32xbf16>, vector<32x32xbf16>, vector<2x32xf32> -> vector<2x32xf32>
    %310 = arith.addf %308, %309 : vector<2x32xf32>
    %311 = arith.negf %310 : vector<2x32xf32>
    %312 = math.exp %311 : vector<2x32xf32>
    %cst_158 = arith.constant 1.000000e+00 : f32
    %313 = vector.broadcast %cst_158 : f32 to vector<2x32xf32>
    %314 = arith.addf %313, %312 : vector<2x32xf32>
    %315 = arith.divf %313, %314 : vector<2x32xf32>
    %c8_i32_159 = arith.constant 8 : i32
    %316 = arith.addi %c8_i32_159, %c5_i32 : i32
    %317 = arith.index_cast %316 : i32 to index
    %c0_160 = arith.constant 0 : index
    %c0_161 = arith.constant 0 : index
    %318 = vector.load %arg9[%317, %c0_160, %c0_161] : memref<32x2x32xf32, #tpu.memory_space<vmem>>, vector<1x2x32xf32>
    %319 = vector.shape_cast %318 : vector<1x2x32xf32> to vector<2x32xf32>
    %cst_162 = arith.constant dense<0.000000e+00> : vector<2x32xf32>
    %320 = tpu.matmul %304, %40, %cst_162 {dimension_numbers = #tpu.dot_dimension_numbers<[1], [0], [0], [1], [0, 0, 1, 1], [], []>} : vector<2x32xbf16>, vector<32x32xbf16>, vector<2x32xf32> -> vector<2x32xf32>
    %321 = arith.addf %319, %320 : vector<2x32xf32>
    %322 = arith.negf %321 : vector<2x32xf32>
    %323 = math.exp %322 : vector<2x32xf32>
    %cst_163 = arith.constant 1.000000e+00 : f32
    %324 = vector.broadcast %cst_163 : f32 to vector<2x32xf32>
    %325 = arith.addf %324, %323 : vector<2x32xf32>
    %326 = arith.divf %324, %325 : vector<2x32xf32>
    %c16_i32_164 = arith.constant 16 : i32
    %327 = arith.addi %c16_i32_164, %c5_i32 : i32
    %328 = arith.index_cast %327 : i32 to index
    %c0_165 = arith.constant 0 : index
    %c0_166 = arith.constant 0 : index
    %329 = vector.load %arg9[%328, %c0_165, %c0_166] : memref<32x2x32xf32, #tpu.memory_space<vmem>>, vector<1x2x32xf32>
    %330 = vector.shape_cast %329 : vector<1x2x32xf32> to vector<2x32xf32>
    %cst_167 = arith.constant dense<0.000000e+00> : vector<2x32xf32>
    %331 = tpu.matmul %304, %42, %cst_167 {dimension_numbers = #tpu.dot_dimension_numbers<[1], [0], [0], [1], [0, 0, 1, 1], [], []>} : vector<2x32xbf16>, vector<32x32xbf16>, vector<2x32xf32> -> vector<2x32xf32>
    %332 = arith.addf %330, %331 : vector<2x32xf32>
    %333 = math.tanh %332 : vector<2x32xf32>
    %c24_i32_168 = arith.constant 24 : i32
    %334 = arith.addi %c24_i32_168, %c5_i32 : i32
    %335 = arith.index_cast %334 : i32 to index
    %c0_169 = arith.constant 0 : index
    %c0_170 = arith.constant 0 : index
    %336 = vector.load %arg9[%335, %c0_169, %c0_170] : memref<32x2x32xf32, #tpu.memory_space<vmem>>, vector<1x2x32xf32>
    %337 = vector.shape_cast %336 : vector<1x2x32xf32> to vector<2x32xf32>
    %cst_171 = arith.constant dense<0.000000e+00> : vector<2x32xf32>
    %338 = tpu.matmul %304, %44, %cst_171 {dimension_numbers = #tpu.dot_dimension_numbers<[1], [0], [0], [1], [0, 0, 1, 1], [], []>} : vector<2x32xbf16>, vector<32x32xbf16>, vector<2x32xf32> -> vector<2x32xf32>
    %339 = arith.addf %337, %338 : vector<2x32xf32>
    %340 = arith.negf %339 : vector<2x32xf32>
    %341 = math.exp %340 : vector<2x32xf32>
    %cst_172 = arith.constant 1.000000e+00 : f32
    %342 = vector.broadcast %cst_172 : f32 to vector<2x32xf32>
    %343 = arith.addf %342, %341 : vector<2x32xf32>
    %344 = arith.divf %342, %343 : vector<2x32xf32>
    %345 = arith.mulf %326, %296 : vector<2x32xf32>
    %346 = arith.mulf %315, %333 : vector<2x32xf32>
    %347 = arith.addf %345, %346 : vector<2x32xf32>
    %348 = math.tanh %347 : vector<2x32xf32>
    %349 = arith.mulf %344, %348 : vector<2x32xf32>
    %350 = arith.truncf %349 : vector<2x32xf32> to vector<2x32xbf16>
    %351 = arith.index_cast %c5_i32 : i32 to index
    %c0_173 = arith.constant 0 : index
    %c0_174 = arith.constant 0 : index
    %352 = vector.load %arg10[%351, %c0_173, %c0_174] : memref<8x2x32xbf16, #tpu.memory_space<vmem>>, vector<1x2x32xbf16>
    %353 = vector.shape_cast %352 : vector<1x2x32xbf16> to vector<2x32xbf16>
    %354 = vector.shape_cast %350 : vector<2x32xbf16> to vector<1x2x32xbf16>
    tpu.vector_store %arg10[%351, %c0_173, %c0_174], %354 {strides = array<i32>} : memref<8x2x32xbf16, #tpu.memory_space<vmem>>, vector<1x2x32xbf16>,
    %c6_i32 = arith.constant 6 : i32
    %355 = arith.truncf %349 : vector<2x32xf32> to vector<2x32xbf16>
    %c0_i32_175 = arith.constant 0 : i32
    %356 = arith.addi %c0_i32_175, %c6_i32 : i32
    %357 = arith.index_cast %356 : i32 to index
    %c0_176 = arith.constant 0 : index
    %c0_177 = arith.constant 0 : index
    %358 = vector.load %arg9[%357, %c0_176, %c0_177] : memref<32x2x32xf32, #tpu.memory_space<vmem>>, vector<1x2x32xf32>
    %359 = vector.shape_cast %358 : vector<1x2x32xf32> to vector<2x32xf32>
    %cst_178 = arith.constant dense<0.000000e+00> : vector<2x32xf32>
    %360 = tpu.matmul %355, %38, %cst_178 {dimension_numbers = #tpu.dot_dimension_numbers<[1], [0], [0], [1], [0, 0, 1, 1], [], []>} : vector<2x32xbf16>, vector<32x32xbf16>, vector<2x32xf32> -> vector<2x32xf32>
    %361 = arith.addf %359, %360 : vector<2x32xf32>
    %362 = arith.negf %361 : vector<2x32xf32>
    %363 = math.exp %362 : vector<2x32xf32>
    %cst_179 = arith.constant 1.000000e+00 : f32
    %364 = vector.broadcast %cst_179 : f32 to vector<2x32xf32>
    %365 = arith.addf %364, %363 : vector<2x32xf32>
    %366 = arith.divf %364, %365 : vector<2x32xf32>
    %c8_i32_180 = arith.constant 8 : i32
    %367 = arith.addi %c8_i32_180, %c6_i32 : i32
    %368 = arith.index_cast %367 : i32 to index
    %c0_181 = arith.constant 0 : index
    %c0_182 = arith.constant 0 : index
    %369 = vector.load %arg9[%368, %c0_181, %c0_182] : memref<32x2x32xf32, #tpu.memory_space<vmem>>, vector<1x2x32xf32>
    %370 = vector.shape_cast %369 : vector<1x2x32xf32> to vector<2x32xf32>
    %cst_183 = arith.constant dense<0.000000e+00> : vector<2x32xf32>
    %371 = tpu.matmul %355, %40, %cst_183 {dimension_numbers = #tpu.dot_dimension_numbers<[1], [0], [0], [1], [0, 0, 1, 1], [], []>} : vector<2x32xbf16>, vector<32x32xbf16>, vector<2x32xf32> -> vector<2x32xf32>
    %372 = arith.addf %370, %371 : vector<2x32xf32>
    %373 = arith.negf %372 : vector<2x32xf32>
    %374 = math.exp %373 : vector<2x32xf32>
    %cst_184 = arith.constant 1.000000e+00 : f32
    %375 = vector.broadcast %cst_184 : f32 to vector<2x32xf32>
    %376 = arith.addf %375, %374 : vector<2x32xf32>
    %377 = arith.divf %375, %376 : vector<2x32xf32>
    %c16_i32_185 = arith.constant 16 : i32
    %378 = arith.addi %c16_i32_185, %c6_i32 : i32
    %379 = arith.index_cast %378 : i32 to index
    %c0_186 = arith.constant 0 : index
    %c0_187 = arith.constant 0 : index
    %380 = vector.load %arg9[%379, %c0_186, %c0_187] : memref<32x2x32xf32, #tpu.memory_space<vmem>>, vector<1x2x32xf32>
    %381 = vector.shape_cast %380 : vector<1x2x32xf32> to vector<2x32xf32>
    %cst_188 = arith.constant dense<0.000000e+00> : vector<2x32xf32>
    %382 = tpu.matmul %355, %42, %cst_188 {dimension_numbers = #tpu.dot_dimension_numbers<[1], [0], [0], [1], [0, 0, 1, 1], [], []>} : vector<2x32xbf16>, vector<32x32xbf16>, vector<2x32xf32> -> vector<2x32xf32>
    %383 = arith.addf %381, %382 : vector<2x32xf32>
    %384 = math.tanh %383 : vector<2x32xf32>
    %c24_i32_189 = arith.constant 24 : i32
    %385 = arith.addi %c24_i32_189, %c6_i32 : i32
    %386 = arith.index_cast %385 : i32 to index
    %c0_190 = arith.constant 0 : index
    %c0_191 = arith.constant 0 : index
    %387 = vector.load %arg9[%386, %c0_190, %c0_191] : memref<32x2x32xf32, #tpu.memory_space<vmem>>, vector<1x2x32xf32>
    %388 = vector.shape_cast %387 : vector<1x2x32xf32> to vector<2x32xf32>
    %cst_192 = arith.constant dense<0.000000e+00> : vector<2x32xf32>
    %389 = tpu.matmul %355, %44, %cst_192 {dimension_numbers = #tpu.dot_dimension_numbers<[1], [0], [0], [1], [0, 0, 1, 1], [], []>} : vector<2x32xbf16>, vector<32x32xbf16>, vector<2x32xf32> -> vector<2x32xf32>
    %390 = arith.addf %388, %389 : vector<2x32xf32>
    %391 = arith.negf %390 : vector<2x32xf32>
    %392 = math.exp %391 : vector<2x32xf32>
    %cst_193 = arith.constant 1.000000e+00 : f32
    %393 = vector.broadcast %cst_193 : f32 to vector<2x32xf32>
    %394 = arith.addf %393, %392 : vector<2x32xf32>
    %395 = arith.divf %393, %394 : vector<2x32xf32>
    %396 = arith.mulf %377, %347 : vector<2x32xf32>
    %397 = arith.mulf %366, %384 : vector<2x32xf32>
    %398 = arith.addf %396, %397 : vector<2x32xf32>
    %399 = math.tanh %398 : vector<2x32xf32>
    %400 = arith.mulf %395, %399 : vector<2x32xf32>
    %401 = arith.truncf %400 : vector<2x32xf32> to vector<2x32xbf16>
    %402 = arith.index_cast %c6_i32 : i32 to index
    %c0_194 = arith.constant 0 : index
    %c0_195 = arith.constant 0 : index
    %403 = vector.load %arg10[%402, %c0_194, %c0_195] : memref<8x2x32xbf16, #tpu.memory_space<vmem>>, vector<1x2x32xbf16>
    %404 = vector.shape_cast %403 : vector<1x2x32xbf16> to vector<2x32xbf16>
    %405 = vector.shape_cast %401 : vector<2x32xbf16> to vector<1x2x32xbf16>
    tpu.vector_store %arg10[%402, %c0_194, %c0_195], %405 {strides = array<i32>} : memref<8x2x32xbf16, #tpu.memory_space<vmem>>, vector<1x2x32xbf16>,
    %c7_i32 = arith.constant 7 : i32
    %406 = arith.truncf %400 : vector<2x32xf32> to vector<2x32xbf16>
    %c0_i32_196 = arith.constant 0 : i32
    %407 = arith.addi %c0_i32_196, %c7_i32 : i32
    %408 = arith.index_cast %407 : i32 to index
    %c0_197 = arith.constant 0 : index
    %c0_198 = arith.constant 0 : index
    %409 = vector.load %arg9[%408, %c0_197, %c0_198] : memref<32x2x32xf32, #tpu.memory_space<vmem>>, vector<1x2x32xf32>
    %410 = vector.shape_cast %409 : vector<1x2x32xf32> to vector<2x32xf32>
    %cst_199 = arith.constant dense<0.000000e+00> : vector<2x32xf32>
    %411 = tpu.matmul %406, %38, %cst_199 {dimension_numbers = #tpu.dot_dimension_numbers<[1], [0], [0], [1], [0, 0, 1, 1], [], []>} : vector<2x32xbf16>, vector<32x32xbf16>, vector<2x32xf32> -> vector<2x32xf32>
    %412 = arith.addf %410, %411 : vector<2x32xf32>
    %413 = arith.negf %412 : vector<2x32xf32>
    %414 = math.exp %413 : vector<2x32xf32>
    %cst_200 = arith.constant 1.000000e+00 : f32
    %415 = vector.broadcast %cst_200 : f32 to vector<2x32xf32>
    %416 = arith.addf %415, %414 : vector<2x32xf32>
    %417 = arith.divf %415, %416 : vector<2x32xf32>
    %c8_i32_201 = arith.constant 8 : i32
    %418 = arith.addi %c8_i32_201, %c7_i32 : i32
    %419 = arith.index_cast %418 : i32 to index
    %c0_202 = arith.constant 0 : index
    %c0_203 = arith.constant 0 : index
    %420 = vector.load %arg9[%419, %c0_202, %c0_203] : memref<32x2x32xf32, #tpu.memory_space<vmem>>, vector<1x2x32xf32>
    %421 = vector.shape_cast %420 : vector<1x2x32xf32> to vector<2x32xf32>
    %cst_204 = arith.constant dense<0.000000e+00> : vector<2x32xf32>
    %422 = tpu.matmul %406, %40, %cst_204 {dimension_numbers = #tpu.dot_dimension_numbers<[1], [0], [0], [1], [0, 0, 1, 1], [], []>} : vector<2x32xbf16>, vector<32x32xbf16>, vector<2x32xf32> -> vector<2x32xf32>
    %423 = arith.addf %421, %422 : vector<2x32xf32>
    %424 = arith.negf %423 : vector<2x32xf32>
    %425 = math.exp %424 : vector<2x32xf32>
    %cst_205 = arith.constant 1.000000e+00 : f32
    %426 = vector.broadcast %cst_205 : f32 to vector<2x32xf32>
    %427 = arith.addf %426, %425 : vector<2x32xf32>
    %428 = arith.divf %426, %427 : vector<2x32xf32>
    %c16_i32_206 = arith.constant 16 : i32
    %429 = arith.addi %c16_i32_206, %c7_i32 : i32
    %430 = arith.index_cast %429 : i32 to index
    %c0_207 = arith.constant 0 : index
    %c0_208 = arith.constant 0 : index
    %431 = vector.load %arg9[%430, %c0_207, %c0_208] : memref<32x2x32xf32, #tpu.memory_space<vmem>>, vector<1x2x32xf32>
    %432 = vector.shape_cast %431 : vector<1x2x32xf32> to vector<2x32xf32>
    %cst_209 = arith.constant dense<0.000000e+00> : vector<2x32xf32>
    %433 = tpu.matmul %406, %42, %cst_209 {dimension_numbers = #tpu.dot_dimension_numbers<[1], [0], [0], [1], [0, 0, 1, 1], [], []>} : vector<2x32xbf16>, vector<32x32xbf16>, vector<2x32xf32> -> vector<2x32xf32>
    %434 = arith.addf %432, %433 : vector<2x32xf32>
    %435 = math.tanh %434 : vector<2x32xf32>
    %c24_i32_210 = arith.constant 24 : i32
    %436 = arith.addi %c24_i32_210, %c7_i32 : i32
    %437 = arith.index_cast %436 : i32 to index
    %c0_211 = arith.constant 0 : index
    %c0_212 = arith.constant 0 : index
    %438 = vector.load %arg9[%437, %c0_211, %c0_212] : memref<32x2x32xf32, #tpu.memory_space<vmem>>, vector<1x2x32xf32>
    %439 = vector.shape_cast %438 : vector<1x2x32xf32> to vector<2x32xf32>
    %cst_213 = arith.constant dense<0.000000e+00> : vector<2x32xf32>
    %440 = tpu.matmul %406, %44, %cst_213 {dimension_numbers = #tpu.dot_dimension_numbers<[1], [0], [0], [1], [0, 0, 1, 1], [], []>} : vector<2x32xbf16>, vector<32x32xbf16>, vector<2x32xf32> -> vector<2x32xf32>
    %441 = arith.addf %439, %440 : vector<2x32xf32>
    %442 = arith.negf %441 : vector<2x32xf32>
    %443 = math.exp %442 : vector<2x32xf32>
    %cst_214 = arith.constant 1.000000e+00 : f32
    %444 = vector.broadcast %cst_214 : f32 to vector<2x32xf32>
    %445 = arith.addf %444, %443 : vector<2x32xf32>
    %446 = arith.divf %444, %445 : vector<2x32xf32>
    %447 = arith.mulf %428, %398 : vector<2x32xf32>
    %448 = arith.mulf %417, %435 : vector<2x32xf32>
    %449 = arith.addf %447, %448 : vector<2x32xf32>
    %450 = math.tanh %449 : vector<2x32xf32>
    %451 = arith.mulf %446, %450 : vector<2x32xf32>
    %452 = arith.truncf %451 : vector<2x32xf32> to vector<2x32xbf16>
    %453 = arith.index_cast %c7_i32 : i32 to index
    %c0_215 = arith.constant 0 : index
    %c0_216 = arith.constant 0 : index
    %454 = vector.load %arg10[%453, %c0_215, %c0_216] : memref<8x2x32xbf16, #tpu.memory_space<vmem>>, vector<1x2x32xbf16>
    %455 = vector.shape_cast %454 : vector<1x2x32xbf16> to vector<2x32xbf16>
    %456 = vector.shape_cast %452 : vector<2x32xbf16> to vector<1x2x32xbf16>
    tpu.vector_store %arg10[%453, %c0_215, %c0_216], %456 {strides = array<i32>} : memref<8x2x32xbf16, #tpu.memory_space<vmem>>, vector<1x2x32xbf16>,
    %c8_i32_217 = arith.constant 8 : i32
    %c0_218 = arith.constant 0 : index
    %c0_219 = arith.constant 0 : index
    %c0_220 = arith.constant 0 : index
    %457 = vector.load %arg10[%c0_218, %c0_219, %c0_220] : memref<8x2x32xbf16, #tpu.memory_space<vmem>>, vector<8x2x32xbf16>
    %c0_221 = arith.constant 0 : index
    %c0_222 = arith.constant 0 : index
    %c0_223 = arith.constant 0 : index
    %458 = vector.load %arg2[%c0_221, %c0_222, %c0_223] : memref<8x2x32xf32, #tpu.memory_space<vmem>>, vector<8x2x32xf32>
    %459 = arith.truncf %458 : vector<8x2x32xf32> to vector<8x2x32xbf16>
    %460 = tpu.iota {dimensions = array<i32: 1>} : vector<8x8xi32>
    %461 = vector.extract_strided_slice %457 {offsets = [0, 0, 0], sizes = [8, 1, 32], strides = [1, 1, 1]} : vector<8x2x32xbf16> to vector<8x1x32xbf16>
    %462 = vector.shape_cast %461 : vector<8x1x32xbf16> to vector<8x32xbf16>
    %463 = vector.extract_strided_slice %459 {offsets = [0, 0, 0], sizes = [8, 1, 32], strides = [1, 1, 1]} : vector<8x2x32xbf16> to vector<8x1x32xbf16>
    %464 = vector.shape_cast %463 : vector<8x1x32xbf16> to vector<8x32xbf16>
    %cst_224 = arith.constant dense<0.000000e+00> : vector<8x8xf32>
    %465 = tpu.matmul %462, %464, %cst_224 {dimension_numbers = #tpu.dot_dimension_numbers<[1], [1], [0], [0], [0, 0, 1, 0], [], []>} : vector<8x32xbf16>, vector<8x32xbf16>, vector<8x8xf32> -> vector<8x8xf32>
    %c0_225 = arith.constant 0 : index
    %466 = memref.load %arg0[%c0_225] : memref<2xi32, #tpu.memory_space<smem>>
    %467 = vector.broadcast %466 : i32 to vector<8x8xi32>
    %468 = arith.cmpi slt, %460, %467 : vector<8x8xi32>
    %cst_226 = arith.constant -1.000000e+30 : f32
    %469 = vector.broadcast %cst_226 : f32 to vector<8x8xf32>
    %470 = arith.select %468, %465, %469 : vector<8x8xi1>, vector<8x8xf32>
    %cst_227 = arith.constant dense<0xFF800000> : vector<8xf32>
    %471 = vector.multi_reduction <maximumf>, %470, %cst_227 [1] : vector<8x8xf32> to vector<8xf32>
    %472 = vector.shape_cast %471 : vector<8xf32> to vector<8x1xf32>
    %473 = vector.broadcast %472 : vector<8x1xf32> to vector<8x8xf32>
    %474 = arith.subf %470, %473 : vector<8x8xf32>
    %475 = math.exp %474 : vector<8x8xf32>
    %cst_228 = arith.constant dense<0.000000e+00> : vector<8xf32>
    %476 = vector.multi_reduction <add>, %475, %cst_228 [1] : vector<8x8xf32> to vector<8xf32>
    %477 = vector.shape_cast %476 : vector<8xf32> to vector<8x1xf32>
    %478 = tpu.reciprocal %477 {approx = true} : vector<8x1xf32> -> vector<8x1xf32>
    %479 = vector.broadcast %478 : vector<8x1xf32> to vector<8x8xf32>
    %480 = arith.mulf %475, %479 : vector<8x8xf32>
    %c0_229 = arith.constant 0 : index
    %c0_230 = arith.constant 0 : index
    %c0_231 = arith.constant 0 : index
    %481 = vector.load %arg8[%c0_229, %c0_230, %c0_231] : memref<2x8x8xf32, #tpu.memory_space<vmem>>, vector<1x8x8xf32>
    %482 = vector.shape_cast %481 : vector<1x8x8xf32> to vector<8x8xf32>
    %483 = vector.shape_cast %480 : vector<8x8xf32> to vector<1x8x8xf32>
    tpu.vector_store %arg8[%c0_229, %c0_230, %c0_231], %483 {strides = array<i32>} : memref<2x8x8xf32, #tpu.memory_space<vmem>>, vector<1x8x8xf32>,
    %484 = vector.extract_strided_slice %457 {offsets = [0, 1, 0], sizes = [8, 1, 32], strides = [1, 1, 1]} : vector<8x2x32xbf16> to vector<8x1x32xbf16>
    %485 = vector.shape_cast %484 : vector<8x1x32xbf16> to vector<8x32xbf16>
    %486 = vector.extract_strided_slice %459 {offsets = [0, 1, 0], sizes = [8, 1, 32], strides = [1, 1, 1]} : vector<8x2x32xbf16> to vector<8x1x32xbf16>
    %487 = vector.shape_cast %486 : vector<8x1x32xbf16> to vector<8x32xbf16>
    %cst_232 = arith.constant dense<0.000000e+00> : vector<8x8xf32>
    %488 = tpu.matmul %485, %487, %cst_232 {dimension_numbers = #tpu.dot_dimension_numbers<[1], [1], [0], [0], [0, 0, 1, 0], [], []>} : vector<8x32xbf16>, vector<8x32xbf16>, vector<8x8xf32> -> vector<8x8xf32>
    %c1_233 = arith.constant 1 : index
    %489 = memref.load %arg0[%c1_233] : memref<2xi32, #tpu.memory_space<smem>>
    %490 = vector.broadcast %489 : i32 to vector<8x8xi32>
    %491 = arith.cmpi slt, %460, %490 : vector<8x8xi32>
    %cst_234 = arith.constant -1.000000e+30 : f32
    %492 = vector.broadcast %cst_234 : f32 to vector<8x8xf32>
    %493 = arith.select %491, %488, %492 : vector<8x8xi1>, vector<8x8xf32>
    %cst_235 = arith.constant dense<0xFF800000> : vector<8xf32>
    %494 = vector.multi_reduction <maximumf>, %493, %cst_235 [1] : vector<8x8xf32> to vector<8xf32>
    %495 = vector.shape_cast %494 : vector<8xf32> to vector<8x1xf32>
    %496 = vector.broadcast %495 : vector<8x1xf32> to vector<8x8xf32>
    %497 = arith.subf %493, %496 : vector<8x8xf32>
    %498 = math.exp %497 : vector<8x8xf32>
    %cst_236 = arith.constant dense<0.000000e+00> : vector<8xf32>
    %499 = vector.multi_reduction <add>, %498, %cst_236 [1] : vector<8x8xf32> to vector<8xf32>
    %500 = vector.shape_cast %499 : vector<8xf32> to vector<8x1xf32>
    %501 = tpu.reciprocal %500 {approx = true} : vector<8x1xf32> -> vector<8x1xf32>
    %502 = vector.broadcast %501 : vector<8x1xf32> to vector<8x8xf32>
    %503 = arith.mulf %498, %502 : vector<8x8xf32>
    %c1_237 = arith.constant 1 : index
    %c0_238 = arith.constant 0 : index
    %c0_239 = arith.constant 0 : index
    %504 = vector.load %arg8[%c1_237, %c0_238, %c0_239] : memref<2x8x8xf32, #tpu.memory_space<vmem>>, vector<1x8x8xf32>
    %505 = vector.shape_cast %504 : vector<1x8x8xf32> to vector<8x8xf32>
    %506 = vector.shape_cast %503 : vector<8x8xf32> to vector<1x8x8xf32>
    tpu.vector_store %arg8[%c1_237, %c0_238, %c0_239], %506 {strides = array<i32>} : memref<2x8x8xf32, #tpu.memory_space<vmem>>, vector<1x8x8xf32>,
    return
  }
}

</mosaic_0001>

<bundles_post_ra>
// kernel: tpu_custom_call.1
= control target key start
LH: loop header
LB: loop body
LE: loop exit
PB: predicated region body
PF: predicated region fallthrough
CT: control target
= control target key end

     0   :  { %13 = vsyncpa [#allocation7], 0  ;;  %s2695_s0 = inlined_call_operand.hbm [shape: s32[2], index: 0, kind: input, shape index: {}]   ;;  %s2696_s1 = inlined_call_operand.hbm [shape: bf16[16,32], index: 1, kind: input, shape index: {}]   ;;  %s2697_s2 = inlined_call_operand.hbm [shape: f32[8,2,32], index: 2, kind: input, shape index: {}]   ;;  %s2698_s3 = inlined_call_operand.vmem [shape: f32[1,2,32], index: 3, kind: input, shape index: {}]   ;;  %s2699_s4 = inlined_call_operand.hbm [shape: f32[1,2,32], index: 4, kind: input, shape index: {}]   ;;  %s2700_s5 = inlined_call_operand.hbm [shape: bf16[4,32,32], index: 5, kind: input, shape index: {}]   ;;  %s2701_s6 = inlined_call_operand.hbm [shape: bf16[4,32,32], index: 6, kind: input, shape index: {}]   ;;  %s2702_s7 = inlined_call_operand.vmem [shape: f32[4,1,32], index: 7, kind: input, shape index: {}]   ;;  %s2703_s8 = inlined_call_operand.hbm [shape: f32[2,8,8], index: 8, kind: output, shape index: {}]  }
   0x1   :  { %14 = vsyncpa [#allocation5], 0 }
   0x2   :  { %15 = vsyncpa [#allocation10], 0 }
   0x3   :  { %16 = vsyncpa [#allocation13], 0  ;;  %s44_s29 = sshll.u32 %s2697_s2, 4  ;;  %s45_s29 = int_to_ptr.hbm [resolvable:$true] %s44_s29 }
   0x4   :  { %17 = vsyncpa [#allocation6], 0  ;;  %s2272_s30 = smov [#allocation9]   ;;  %s2273_s10 = smov 32  }
   0x5   :  { %s46_s9 = sshll.u32 %s2272_s30, 4  ;;  %s2274_s11 = smov 2   ;;  %s47_s9 = int_to_ptr.vmem [resolvable:$true] %s46_s9 }
   0x6   :  { %52 = dma.hbm_to_vmem [thread:$0]  %s45_s29, 256, %s47_s9, [#allocation10], %s2273_s10, %s2273_s10, %s2274_s11  }
   0x7   :  { %s70_s14 = sshll.u32 %s2700_s5, 4  ;;  %s2275_s15 = smov [#allocation12]   ;;  %s71_s14 = int_to_ptr.hbm [resolvable:$true] %s70_s14 }
   0x8   :  { %s72_s16 = sshll.u32 %s2275_s15, 4  ;;  %s23_s19 = sshll.u32 %s2695_s0, 4  ;;  %s73_s16 = int_to_ptr.vmem [resolvable:$true] %s72_s16  ;;  %s24_s19 = int_to_ptr.hbm [resolvable:$true] %s23_s19 }
   0x9   :  { %s2276_s2 = smov 64   ;;  %s2277_s20 = smov 4  }
   0xa   :  { %78 = dma.hbm_to_vmem [thread:$0]  %s71_s14, 1024, %s73_s16, [#allocation13], %s2276_s2, %s2276_s2, %s2277_s20  }
   0xb   :  { %s31_s23 = sshll.u32 %s2696_s1, 4  ;;  %s2278_s24 = smov [#allocation4]   ;;  %s32_s23 = int_to_ptr.hbm [resolvable:$true] %s31_s23 }
   0xc   :  { %26 = dma.hbm_to_smem %s24_s19, 16, %s2278_s24, [#allocation7]  }
   0xd   :  { %s2279_s5 = smov [#allocation8]   ;;  %s60_s28 = sshll.u32 %s2699_s4, 4  ;;  %s61_s28 = int_to_ptr.hbm [resolvable:$true] %s60_s28 }
   0xe   :  { %s33_s25 = sshll.u32 %s2279_s5, 4  ;;  %s83_s30 = sshll.u32 %s2701_s6, 4  ;;  %s34_s25 = int_to_ptr.vmem [resolvable:$true] %s33_s25  ;;  %s84_s30 = int_to_ptr.hbm [resolvable:$true] %s83_s30 }
   0xf   :  { %39 = dma.hbm_to_vmem [thread:$0]  %s32_s23, 128, %s34_s25, [#allocation5], %s2276_s2, %s2276_s2, %s2277_s20  }
  0x10   :  { %s2280_s9 = smov [#allocation11]   ;;  %s2281_s1 = smov [#allocation14]  }
  0x11   :  { %s62_s10 = sshll.u32 %s2280_s9, 4  ;;  %s85_s11 = sshll.u32 %s2281_s1, 4  ;;  %s63_s10 = int_to_ptr.vmem [resolvable:$true] %s62_s10  ;;  %s86_s11 = int_to_ptr.vmem [resolvable:$true] %s85_s11 }
  0x12   :  { %65 = dma.hbm_to_vmem [thread:$0]  %s61_s28, 32, %s63_s10, [#allocation10]  }
  0x13   :  { %91 = dma.hbm_to_vmem [thread:$0]  %s84_s30, 1024, %s86_s11, [#allocation13], %s2276_s2, %s2276_s2, %s2277_s20  }
  0x14   :  { %2262 = dma.done.wait [#allocation7], 16  }
  0x15   :  { %2263 = vsyncadd [#allocation7], 4294967280 }
  0x16   :  { %2264 = dma.done.wait [#allocation5], 128  }
  0x17   :  { %2265 = vsyncadd [#allocation5], 4294967168 }
  0x18   :  { %2266 = dma.done.wait [#allocation10], 288  }
  0x19   :  { %2267 = vsyncadd [#allocation10], 4294967008 }
  0x1a   :  { %2268 = dma.done.wait [#allocation13], 2048  }
  0x1b   :  { %2269 = vsyncadd [#allocation13], 4294965248 }
  0x1c   :  { %118 = sfence }
  0x1d   :  { %v1930_v0 = vld [vmem:[#allocation12 + $0x8] sm:$0xff]  ;;  %v1932_v1 = vld [vmem:[#allocation12 + $0x18] sm:$0xff]  ;;  %v1929_v3 = vld [vmem:[#allocation12] sm:$0xff]  ;;  %vm147_vm0 = vcmask 261120   ;;  %vm179_vm1 = vcmask 254976   ;;  %vm562_vm14 = vcmask 253952  }
  0x1e   :  { %v1936_v2 = vld [vmem:[#allocation12 + $0x38] sm:$0xff]  ;;  %157 = vmatpush.bf16.msra.mxu0 %v1930_v0  ;;  %216 = vmatpush.bf16.msra.mxu1 %v1932_v1  ;;  %v1931_v4 = vld [vmem:[#allocation12 + $0x10] sm:$0xff]  ;;  %v1934_v5 = vld [vmem:[#allocation12 + $0x28] sm:$0xff]  ;;  %s1927_s19 = sld [smem:[#allocation4 + $0x1]]  ;;  %s2282_s2 = smov [#allocation15]  }
  0x1f   :  { %334 = vmatpush.bf16.msra.mxu3 %v1936_v2  ;;  %v1935_v6 = vld [vmem:[#allocation12 + $0x30] sm:$0xff]  ;;  %v2348_v7 = vld [vmem:[#allocation14 + $0x8] sm:$0xff]  ;;  %275 = vmatpush.bf16.msra.mxu2 %v1934_v5  ;;  %v2350_v8 = vld [vmem:[#allocation14 + $0x18] sm:$0xff]  ;;  %s1768_s20 = sshll.u32 %s2282_s2, 4  ;;  %s1770_s23 = sshll.u32 %s2703_s8, 4  ;;  %s1769_s20 = int_to_ptr.vmem [resolvable:$true] %s1768_s20  ;;  %s1771_s23 = int_to_ptr.hbm [resolvable:$true] %s1770_s23 }
  0x20   :  { %v1933_v9 = vld [vmem:[#allocation12 + $0x20] sm:$0xff]  ;;  %v2352_v11 = vld [vmem:[#allocation14 + $0x28] sm:$0xff]  ;;  %v2355_v12 = vld [vmem:[#allocation14 + $0x38] sm:$0xff]  ;;  %s2283_s24 = smov 128   ;;  %s2284_s5 = smov 8  }
  0x21   :  { %v1928_v10 = vld [vmem:[#allocation8] sm:$0xff]  ;;  %v2360_v14 = vld [vmem:[#allocation14 + $0x10] sm:$0xff]  ;;  %v1960_v29 = vld [vmem:[%s2702_s7 + $0x3] ss:$0 sm:$0xff] }
  0x22   :  { %158 = vmatpush.bf16.msra.mxu0 %v1929_v3  ;;  %217 = vmatpush.bf16.msra.mxu1 %v1931_v4  ;;  %v2358_v13 = vld [vmem:[#allocation14] sm:$0xff]  ;;  %v2370_v16 = vld [vmem:[#allocation14 + $0x30] sm:$0xff]  ;;  %v1961_v43 = vld [vmem:[%s2702_s7 + $0x2] ss:$0 sm:$0xff] }
  0x23   :  { %335 = vmatpush.bf16.msra.mxu3 %v1935_v6  ;;  %276 = vmatpush.bf16.msra.mxu2 %v1933_v9  ;;  %v2366_v15 = vld [vmem:[#allocation14 + $0x20] sm:$0xff]  ;;  %v384_v17 = vld [vmem:[%s2698_s3] sm:$0x3] }
  0x24   :  { %v386_v18 = vpack.c.bf16 %v384_v17, %v384_v17  ;;  %v1958_v19 = vld [vmem:[%s2702_s7] ss:$0 sm:$0xff]  ;;  %v1959_v20 = vld [vmem:[%s2702_s7 + $0x1] ss:$0 sm:$0xff]  ;;  %s1649_s7 = sld [smem:[#allocation4]] }
  0x25   :  { %1798 = vmatmul.msk.bf16.vlgmr.msra.gmra.mxu0 %vm147_vm0, %v1928_v10  ;;  %1808 = vmatmul.msk.bf16.vlgmr.msra.gmra.mxu1 %vm147_vm0, %v1928_v10 }
  0x26   :  { %409 = vmatpush.bf16.msrb.mxu0 %v2348_v7  ;;  %455 = vmatpush.bf16.msrb.mxu1 %v2350_v8 }
  0x27   :  { %1828 = vmatmul.msk.bf16.vlgmr.msra.gmra.mxu3 %vm147_vm0, %v1928_v10  ;;  %501 = vmatpush.bf16.msrb.mxu2 %v2352_v11 }
  0x28   :  { %529 = vmatpush.bf16.msrb.mxu3 %v2355_v12  ;;  %1818 = vmatmul.msk.bf16.vlgmr.msra.gmra.mxu2 %vm147_vm0, %v1928_v10 }
  0x2a   :  { %410 = vmatpush.bf16.msrb.mxu0 %v2358_v13  ;;  %456 = vmatpush.bf16.msrb.mxu1 %v2360_v14 }
  0x2b   :  { %502 = vmatpush.bf16.msrb.mxu2 %v2366_v15 }
  0x2c   :  { %530 = vmatpush.bf16.msrb.mxu3 %v2370_v16 }
  0x2e   :  { %575 = vmatpush.bf16.msra.mxu0 %v2348_v7  ;;  %610 = vmatpush.bf16.msra.mxu1 %v2350_v8 }
  0x2f   :  { %645 = vmatpush.bf16.msra.mxu2 %v2352_v11 }
  0x30   :  { %662 = vmatpush.bf16.msra.mxu3 %v2355_v12 }
  0x32   :  { %576 = vmatpush.bf16.msra.mxu0 %v2358_v13  ;;  %611 = vmatpush.bf16.msra.mxu1 %v2360_v14 }
  0x33   :  { %646 = vmatpush.bf16.msra.mxu2 %v2366_v15 }
  0x34   :  { %663 = vmatpush.bf16.msra.mxu3 %v2370_v16 }
  0x35   :  { %1837 = vmatmul.msk.bf16.vlgmr.msrb.gmra.mxu0 %vm147_vm0, %v386_v18  ;;  %1847 = vmatmul.msk.bf16.vlgmr.msrb.gmra.mxu1 %vm147_vm0, %v386_v18 }
  0x36   :  { %708 = vmatpush.bf16.msrb.mxu0 %v2348_v7  ;;  %743 = vmatpush.bf16.msrb.mxu1 %v2350_v8 }
  0x37   :  { %1866 = vmatmul.msk.bf16.vlgmr.msrb.gmra.mxu3 %vm147_vm0, %v386_v18 }
  0x38   :  { %1857 = vmatmul.msk.bf16.vlgmr.msrb.gmra.mxu2 %vm147_vm0, %v386_v18  ;;  %795 = vmatpush.bf16.msrb.mxu3 %v2355_v12 }
  0x39   :  { %778 = vmatpush.bf16.msrb.mxu2 %v2352_v11 }
  0x3a   :  { %709 = vmatpush.bf16.msrb.mxu0 %v2358_v13  ;;  %744 = vmatpush.bf16.msrb.mxu1 %v2360_v14 }
  0x3c   :  { %796 = vmatpush.bf16.msrb.mxu3 %v2370_v16 }
  0x3d   :  { %779 = vmatpush.bf16.msrb.mxu2 %v2366_v15 }
  0xa2   :  { %v160_v21 = vpop.f32.mrf.mxu0  ;;  %v219_v22 = vpop.f32.mrf.mxu1 }
  0xa3   :  { %v161_v23 = vadd.f32 %v1958_v19, %v160_v21  ;;  %v220_v24 = vadd.f32 %v1959_v20, %v219_v22 }
  0xa5   :  { %v167_v25 = vrot.slane %v161_v23, 2  ;;  %v168_v26 = vrot.slane %v161_v23, 4  ;;  %v169_v27 = vrot.slane %v161_v23, 6  ;;  %180 = vst.msk [vmem:[#allocation2] sm:$0x3] %vm179_vm1, %v161_v23  ;;  %v226_v28 = vrot.slane %v220_v24, 2 }
  0xa6   :  { %239 = vst.msk [vmem:[#allocation2 + $0x10] sm:$0x3] %vm179_vm1, %v220_v24  ;;  %v227_v30 = vrot.slane %v220_v24, 4  ;;  %v228_v31 = vrot.slane %v220_v24, 6 }
  0xa7   :  { %181 = vst.msk [vmem:[#allocation2 + $0x2] sm:$0x3] %vm179_vm1, %v167_v25 }
  0xa8   :  { %182 = vst.msk [vmem:[#allocation2 + $0x4] sm:$0x3] %vm179_vm1, %v168_v26 }
  0xa9   :  { %183 = vst.msk [vmem:[#allocation2 + $0x6] sm:$0x3] %vm179_vm1, %v169_v27 }
  0xaa   :  { %v337_v32 = vpop.f32.mrf.mxu3  ;;  %240 = vst.msk [vmem:[#allocation2 + $0x12] sm:$0x3] %vm179_vm1, %v226_v28  ;;  %v162_v34 = vpop.f32.mrf.mxu0 }
  0xab   :  { %v338_v33 = vadd.f32 %v1960_v29, %v337_v32  ;;  %v221_v35 = vpop.f32.mrf.mxu1  ;;  %241 = vst.msk [vmem:[#allocation2 + $0x14] sm:$0x3] %vm179_vm1, %v227_v30  ;;  %v163_v36 = vadd.f32 %v1958_v19, %v162_v34  ;;  %v278_v37 = vpop.f32.mrf.mxu2 }
  0xac   :  { %242 = vst.msk [vmem:[#allocation2 + $0x16] sm:$0x3] %vm179_vm1, %v228_v31  ;;  %v222_v41 = vadd.f32 %v1959_v20, %v221_v35  ;;  %v279_v48 = vadd.f32 %v1961_v43, %v278_v37  ;;  %v387_v49 = vld [vmem:[#allocation2] sm:$0x3] }
  0xad   :  { %v344_v38 = vrot.slane %v338_v33, 2  ;;  %v345_v39 = vrot.slane %v338_v33, 4  ;;  %v346_v40 = vrot.slane %v338_v33, 6  ;;  %357 = vst.msk [vmem:[#allocation2 + $0x30] sm:$0x3] %vm179_vm1, %v338_v33  ;;  %v170_v42 = vrot.slane %v163_v36, 2 }
  0xae   :  { %v171_v44 = vrot.slane %v163_v36, 4  ;;  %v172_v45 = vrot.slane %v163_v36, 6  ;;  %184 = vst.msk [vmem:[#allocation2 + $0x8] sm:$0x3] %vm179_vm1, %v163_v36  ;;  %v229_v46 = vrot.slane %v222_v41, 2  ;;  %v230_v53 = vrot.slane %v222_v41, 4 }
  0xaf   :  { %358 = vst.msk [vmem:[#allocation2 + $0x32] sm:$0x3] %vm179_vm1, %v344_v38  ;;  %v436_v51 = vld [vmem:[#allocation2 + $0x10] sm:$0x3]  ;;  %v231_v57 = vrot.slane %v222_v41, 6  ;;  %v285_v60 = vrot.slane %v279_v48, 2 }
  0xb0   :  { %359 = vst.msk [vmem:[#allocation2 + $0x34] sm:$0x3] %vm179_vm1, %v345_v39  ;;  %v286_v62 = vrot.slane %v279_v48, 4  ;;  %v287_v0 = vrot.slane %v279_v48, 6 }
  0xb1   :  { %360 = vst.msk [vmem:[#allocation2 + $0x36] sm:$0x3] %vm179_vm1, %v346_v40 }
  0xb2   :  { %v339_v47 = vpop.f32.mrf.mxu3  ;;  %185 = vst.msk [vmem:[#allocation2 + $0xa] sm:$0x3] %vm179_vm1, %v170_v42  ;;  %v412_v50 = vpop.f32.mrf.mxu0 }
  0xb3   :  { %v458_v52 = vpop.f32.mrf.mxu1  ;;  %186 = vst.msk [vmem:[#allocation2 + $0xc] sm:$0x3] %vm179_vm1, %v171_v44  ;;  %v416_v54 = vadd.f32 %v412_v50, %v387_v49  ;;  %v280_v56 = vpop.f32.mrf.mxu2  ;;  %v340_v61 = vadd.f32 %v1960_v29, %v339_v47  ;;  %v385_v50 = vld [vmem:[#allocation11] sm:$0x3] }
  0xb4   :  { %v462_v55 = vadd.f32 %v458_v52, %v436_v51  ;;  %187 = vst.msk [vmem:[#allocation2 + $0xe] sm:$0x3] %vm179_vm1, %v172_v45  ;;  %v510_v63 = vld [vmem:[#allocation2 + $0x30] sm:$0x3]  ;;  %v281_v3 = vadd.f32 %v1961_v43, %v280_v56 }
  0xb5   :  { %243 = vst.msk [vmem:[#allocation2 + $0x18] sm:$0x3] %vm179_vm1, %v222_v41  ;;  %v1838_v58 = vmul.f32 -1.442695, %v416_v54  ;;  %v347_v2 = vrot.slane %v340_v61, 2  ;;  %v348_v9 = vrot.slane %v340_v61, 4 }
  0xb6   :  { %v1848_v59 = vmul.f32 -1.442695, %v462_v55  ;;  %244 = vst.msk [vmem:[#allocation2 + $0x1a] sm:$0x3] %vm179_vm1, %v229_v46  ;;  %v349_v17 = vrot.slane %v340_v61, 6  ;;  %v288_v22 = vrot.slane %v281_v3, 2 }
  0xb7   :  { %245 = vst.msk [vmem:[#allocation2 + $0x1c] sm:$0x3] %vm179_vm1, %v230_v53  ;;  %1962 = vpow2.f32 %v1838_v58  ;;  %v289_v24 = vrot.slane %v281_v3, 4  ;;  %v290_v25 = vrot.slane %v281_v3, 6 }
  0xb8   :  { %246 = vst.msk [vmem:[#allocation2 + $0x1e] sm:$0x3] %vm179_vm1, %v231_v57  ;;  %1964 = vpow2.f32 %v1848_v59 }
  0xb9   :  { %298 = vst.msk [vmem:[#allocation2 + $0x20] sm:$0x3] %vm179_vm1, %v279_v48 }
  0xba   :  { %v532_v1 = vpop.f32.mrf.mxu3  ;;  %299 = vst.msk [vmem:[#allocation2 + $0x22] sm:$0x3] %vm179_vm1, %v285_v60  ;;  %v414_v5 = vpop.f32.mrf.mxu0 }
  0xbb   :  { %v536_v4 = vadd.f32 %v532_v1, %v510_v63  ;;  %v460_v6 = vpop.f32.mrf.mxu1  ;;  %300 = vst.msk [vmem:[#allocation2 + $0x24] sm:$0x3] %vm179_vm1, %v286_v62  ;;  %v504_v10 = vpop.f32.mrf.mxu2 }
  0xbc   :  { %301 = vst.msk [vmem:[#allocation2 + $0x26] sm:$0x3] %vm179_vm1, %v287_v0 }
  0xbd   :  { %v1867_v18 = vmul.f32 -1.442695, %v536_v4  ;;  %v1963_v19 = vpop.eup %1962  ;;  %361 = vst.msk [vmem:[#allocation2 + $0x38] sm:$0x3] %vm179_vm1, %v340_v61 }
  0xbe   :  { %v1965_v20 = vpop.eup %1964  ;;  %362 = vst.msk [vmem:[#allocation2 + $0x3a] sm:$0x3] %vm179_vm1, %v347_v2  ;;  %v420_v21 = vadd.f32 1.0, %v1963_v19 }
  0xbf   :  { %1966 = vpow2.f32 %v1867_v18  ;;  %363 = vst.msk [vmem:[#allocation2 + $0x3c] sm:$0x3] %vm179_vm1, %v348_v9  ;;  %v466_v23 = vadd.f32 1.0, %v1965_v20  ;;  %v565_v9 = vld [vmem:[#allocation2 + $0x2] sm:$0x3] }
  0xc0   :  { %364 = vst.msk [vmem:[#allocation2 + $0x3e] sm:$0x3] %vm179_vm1, %v349_v17  ;;  %1968 = vrcp.f32 %v420_v21  ;;  %v482_v27 = vld [vmem:[#allocation2 + $0x20] sm:$0x3]  ;;  %v432_v38 = vand.u32 2147483648, %v420_v21  ;;  %vm426_vm4 = vweird.f32 %v420_v21 }
  0xc1   :  { %1970 = vrcp.f32 %v466_v23  ;;  %302 = vst.msk [vmem:[#allocation2 + $0x28] sm:$0x3] %vm179_vm1, %v281_v3  ;;  %v508_v32 = vadd.f32 %v504_v10, %v482_v27  ;;  %v478_v39 = vand.u32 2147483648, %v466_v23  ;;  %v430_v41 = vand.u32 2147483647, %v420_v21 }
  0xc2   :  { %v534_v26 = vpop.f32.mrf.mxu3  ;;  %303 = vst.msk [vmem:[#allocation2 + $0x2a] sm:$0x3] %vm179_vm1, %v288_v22  ;;  %v476_v43 = vand.u32 2147483647, %v466_v23  ;;  %vm472_vm5 = vweird.f32 %v466_v23  ;;  %v433_v47 = vor.u32 1.1754944e-38, %v432_v38 }
  0xc3   :  { %304 = vst.msk [vmem:[#allocation2 + $0x2c] sm:$0x3] %vm179_vm1, %v289_v24  ;;  %v506_v28 = vpop.f32.mrf.mxu2  ;;  %v479_v49 = vor.u32 1.1754944e-38, %v478_v39  ;;  %vm431_vm8 = vcmp.eq.f32.partialorder %v430_v41, 8.507059e+37  ;;  %v603_v17 = vld [vmem:[#allocation2 + $0x12] sm:$0x3] }
  0xc4   :  { %305 = vst.msk [vmem:[#allocation2 + $0x2e] sm:$0x3] %vm179_vm1, %v290_v25  ;;  %vm477_vm9 = vcmp.eq.f32.partialorder %v476_v43, 8.507059e+37  ;;  %v655_v24 = vld [vmem:[#allocation2 + $0x32] sm:$0x3] }
  0xc5   :  { %v1967_v29 = vpop.eup %1966 }
  0xc6   :  { %v540_v30 = vadd.f32 1.0, %v1967_v29  ;;  %v1969_v31 = vpop.eup %1968 }
  0xc7   :  { %v1971_v33 = vpop.eup %1970  ;;  %v422_v34 = vmul.f32 %v1969_v31, %v420_v21  ;;  %vm427_vm2 = vweird.f32 %v1969_v31 }
  0xc8   :  { %1972 = vrcp.f32 %v540_v30  ;;  %v468_v35 = vmul.f32 %v1971_v33, %v466_v23  ;;  %vm473_vm3 = vweird.f32 %v1971_v33  ;;  %vm428_vm6 = vmor %vm426_vm4, %vm427_vm2  ;;  %v552_v62 = vand.u32 2147483648, %v540_v30 }
  0xc9   :  { %v423_v36 = vsub.f32 1.0, %v422_v34  ;;  %1974 = vtanh.f32 %v508_v32  ;;  %vm474_vm7 = vmor %vm472_vm5, %vm473_vm3  ;;  %vm546_vm11 = vweird.f32 %v540_v30  ;;  %v550_v63 = vand.u32 2147483647, %v540_v30 }
  0xca   :  { %v469_v37 = vsub.f32 1.0, %v468_v35  ;;  %v553_v1 = vor.u32 1.1754944e-38, %v552_v62 }
  0xcb   :  { %v424_v40 = vmul.f32 %v1969_v31, %v423_v36  ;;  %vm551_vm13 = vcmp.eq.f32.partialorder %v550_v63, 8.507059e+37 }
  0xcc   :  { %v470_v42 = vmul.f32 %v1971_v33, %v469_v37  ;;  %v638_v37 = vld [vmem:[#allocation2 + $0x22] sm:$0x3] }
  0xcd   :  { %v425_v45 = vadd.f32 %v1969_v31, %v424_v40 }
  0xce   :  { %v1973_v44 = vpop.eup %1972  ;;  %v471_v48 = vadd.f32 %v1971_v33, %v470_v42 }
  0xcf   :  { %v542_v46 = vmul.f32 %v1973_v44, %v540_v30  ;;  %v429_v51 = vsel %vm428_vm6, %v1969_v31, %v425_v45  ;;  %v1975_v52 = vpop.eup %1974  ;;  %vm547_vm10 = vweird.f32 %v1973_v44 }
  0xd0   :  { %v434_v54 = vsel %vm431_vm8, %v433_v47, %v429_v51  ;;  %v475_v55 = vsel %vm474_vm7, %v1971_v33, %v471_v48  ;;  %vm548_vm12 = vmor %vm546_vm11, %vm547_vm10 }
  0xd1   :  { %v543_v53 = vsub.f32 1.0, %v542_v46  ;;  %v480_v56 = vsel %vm477_vm9, %v479_v49, %v475_v55  ;;  %v557_v57 = vmul.f32 %v1975_v52, %v434_v54 }
  0xd2   :  { %v556_v59 = vmul.f32 %v480_v56, %v385_v50 }
  0xd3   :  { %v544_v58 = vmul.f32 %v1973_v44, %v543_v53 }
  0xd4   :  { %v2443_v60 = vadd.f32 %v557_v57, %v556_v59 }
  0xd5   :  { %v545_v61 = vadd.f32 %v1973_v44, %v544_v58 }
  0xd6   :  { %1976 = vtanh.f32 %v2443_v60 }
  0xd7   :  { %v549_v0 = vsel %vm548_vm12, %v1973_v44, %v545_v61 }
  0xd8   :  { %v554_v3 = vsel %vm551_vm13, %v553_v1, %v549_v0 }
  0xdc   :  { %v1977_v2 = vpop.eup %1976 }
  0xdd   :  { %v560_v4 = vmul.f32 %v1977_v2, %v554_v3 }
  0xdf   :  { %v561_v5 = vpack.c.bf16 %v560_v4, %v560_v4 }
  0xe1   :  { %563 = vst.msk [vmem:[#allocation3] sm:$0x1] %vm562_vm14, %v561_v5  ;;  %1868 = vmatmul.msk.bf16.vlgmr.msra.gmra.mxu0 %vm147_vm0, %v561_v5  ;;  %1870 = vmatmul.msk.bf16.vlgmr.msra.gmra.mxu1 %vm147_vm0, %v561_v5 }
  0xe2   :  { %1872 = vmatmul.msk.bf16.vlgmr.msra.gmra.mxu2 %vm147_vm0, %v561_v5  ;;  %1873 = vmatmul.msk.bf16.vlgmr.msra.gmra.mxu3 %vm147_vm0, %v561_v5 }
  0xe3   :  { %841 = vmatpush.bf16.msra.mxu0 %v2348_v7  ;;  %876 = vmatpush.bf16.msra.mxu1 %v2350_v8 }
  0xe4   :  { %928 = vmatpush.bf16.msra.mxu3 %v2355_v12  ;;  %911 = vmatpush.bf16.msra.mxu2 %v2352_v11 }
  0xe7   :  { %842 = vmatpush.bf16.msra.mxu0 %v2358_v13  ;;  %877 = vmatpush.bf16.msra.mxu1 %v2360_v14 }
  0xe8   :  { %v2457_v6 = vld [vmem:[#allocation3] sm:$0x1]  ;;  %912 = vmatpush.bf16.msra.mxu2 %v2366_v15  ;;  %929 = vmatpush.bf16.msra.mxu3 %v2370_v16 }
  0xe9   :  { %1522 = vst [vmem:[#allocation1] ss:$9 sm:$0xff] %v2457_v6 }
 0x15e   :  { %v578_v10 = vpop.f32.mrf.mxu0  ;;  %v613_v18 = vpop.f32.mrf.mxu1 }
 0x15f   :  { %v582_v19 = vadd.f32 %v578_v10, %v565_v9  ;;  %v617_v20 = vadd.f32 %v613_v18, %v603_v17 }
 0x161   :  { %v1869_v21 = vmul.f32 -1.442695, %v582_v19  ;;  %v1871_v22 = vmul.f32 -1.442695, %v617_v20 }
 0x163   :  { %1978 = vpow2.f32 %v1869_v21 }
 0x164   :  { %1980 = vpow2.f32 %v1871_v22 }
 0x165   :  { %v648_v23 = vpop.f32.mrf.mxu2  ;;  %v665_v25 = vpop.f32.mrf.mxu3 }
 0x166   :  { %v669_v26 = vadd.f32 %v665_v25, %v655_v24  ;;  %v580_v27 = vpop.f32.mrf.mxu0  ;;  %v615_v28 = vpop.f32.mrf.mxu1  ;;  %v652_v40 = vadd.f32 %v648_v23, %v638_v37  ;;  %v698_v24 = vld [vmem:[#allocation2 + $0x4] sm:$0x3] }
 0x168   :  { %v1874_v29 = vmul.f32 -1.442695, %v669_v26  ;;  %v736_v26 = vld [vmem:[#allocation2 + $0x14] sm:$0x3] }
 0x169   :  { %v1979_v30 = vpop.eup %1978 }
 0x16a   :  { %v1981_v31 = vpop.eup %1980  ;;  %v586_v32 = vadd.f32 1.0, %v1979_v30  ;;  %1982 = vpow2.f32 %v1874_v29 }
 0x16b   :  { %v621_v33 = vadd.f32 1.0, %v1981_v31 }
 0x16c   :  { %1984 = vrcp.f32 %v586_v32  ;;  %v598_v46 = vand.u32 2147483648, %v586_v32  ;;  %v596_v49 = vand.u32 2147483647, %v586_v32  ;;  %vm592_vm2 = vweird.f32 %v586_v32 }
 0x16d   :  { %1986 = vrcp.f32 %v621_v33  ;;  %v650_v34 = vpop.f32.mrf.mxu2  ;;  %v667_v35 = vpop.f32.mrf.mxu3  ;;  %v633_v47 = vand.u32 2147483648, %v621_v33  ;;  %v631_v51 = vand.u32 2147483647, %v621_v33  ;;  %vm627_vm3 = vweird.f32 %v621_v33 }
 0x16e   :  { %v599_v54 = vor.u32 1.1754944e-38, %v598_v46  ;;  %vm597_vm6 = vcmp.eq.f32.partialorder %v596_v49, 8.507059e+37  ;;  %v771_v46 = vld [vmem:[#allocation2 + $0x24] sm:$0x3] }
 0x16f   :  { %v634_v57 = vor.u32 1.1754944e-38, %v633_v47  ;;  %vm632_vm7 = vcmp.eq.f32.partialorder %v631_v51, 8.507059e+37 }
 0x170   :  { %v1983_v36 = vpop.eup %1982 }
 0x171   :  { %v673_v38 = vadd.f32 1.0, %v1983_v36 }
 0x172   :  { %v1985_v39 = vpop.eup %1984 }
 0x173   :  { %v1987_v41 = vpop.eup %1986  ;;  %v588_v42 = vmul.f32 %v1985_v39, %v586_v32  ;;  %1988 = vrcp.f32 %v673_v38  ;;  %vm593_vm15 = vweird.f32 %v1985_v39  ;;  %v685_v9 = vand.u32 2147483648, %v673_v38 }
 0x174   :  { %v623_v43 = vmul.f32 %v1987_v41, %v621_v33  ;;  %1990 = vtanh.f32 %v652_v40  ;;  %vm628_vm1 = vweird.f32 %v1987_v41  ;;  %vm594_vm4 = vmor %vm592_vm2, %vm593_vm15  ;;  %vm679_vm9 = vweird.f32 %v673_v38  ;;  %v788_v33 = vld [vmem:[#allocation2 + $0x34] sm:$0x3] }
 0x175   :  { %v589_v44 = vsub.f32 1.0, %v588_v42  ;;  %vm629_vm5 = vmor %vm627_vm3, %vm628_vm1  ;;  %v683_v10 = vand.u32 2147483647, %v673_v38  ;;  %v686_v18 = vor.u32 1.1754944e-38, %v685_v9 }
 0x176   :  { %v624_v45 = vsub.f32 1.0, %v623_v43 }
 0x177   :  { %v590_v48 = vmul.f32 %v1985_v39, %v589_v44  ;;  %vm684_vm11 = vcmp.eq.f32.partialorder %v683_v10, 8.507059e+37 }
 0x178   :  { %v625_v50 = vmul.f32 %v1987_v41, %v624_v45 }
 0x179   :  { %v1989_v52 = vpop.eup %1988  ;;  %v591_v53 = vadd.f32 %v1985_v39, %v590_v48 }
 0x17a   :  { %v626_v55 = vadd.f32 %v1987_v41, %v625_v50  ;;  %v675_v56 = vmul.f32 %v1989_v52, %v673_v38  ;;  %v1991_v59 = vpop.eup %1990  ;;  %vm680_vm8 = vweird.f32 %v1989_v52 }
 0x17b   :  { %v595_v58 = vsel %vm594_vm4, %v1985_v39, %v591_v53  ;;  %vm681_vm10 = vmor %vm679_vm9, %vm680_vm8 }
 0x17c   :  { %v600_v61 = vsel %vm597_vm6, %v599_v54, %v595_v58  ;;  %v630_v62 = vsel %vm629_vm5, %v1987_v41, %v626_v55  ;;  %v676_v63 = vsub.f32 1.0, %v675_v56 }
 0x17d   :  { %v635_v0 = vsel %vm632_vm7, %v634_v57, %v630_v62  ;;  %v690_v1 = vmul.f32 %v1991_v59, %v600_v61 }
 0x17e   :  { %v689_v2 = vmul.f32 %v635_v0, %v2443_v60  ;;  %v677_v3 = vmul.f32 %v1989_v52, %v676_v63  ;;  %v2477_v60 = vld [vmem:[#allocation1] sm:$0xf] }
 0x180   :  { %v2463_v4 = vadd.f32 %v690_v1, %v689_v2  ;;  %v678_v5 = vadd.f32 %v1989_v52, %v677_v3 }
 0x182   :  { %1992 = vtanh.f32 %v2463_v4  ;;  %v682_v17 = vsel %vm681_vm10, %v1989_v52, %v678_v5 }
 0x183   :  { %v687_v20 = vsel %vm684_vm11, %v686_v18, %v682_v17 }
 0x188   :  { %v1993_v19 = vpop.eup %1992 }
 0x189   :  { %v693_v21 = vmul.f32 %v1993_v19, %v687_v20 }
 0x18b   :  { %v694_v22 = vpack.c.bf16 %v693_v21, %v693_v21 }
 0x18d   :  { %696 = vst.msk [vmem:[#allocation3 + $0x1] sm:$0x1] %vm562_vm14, %v694_v22  ;;  %1875 = vmatmul.msk.bf16.vlgmr.msrb.gmra.mxu0 %vm147_vm0, %v694_v22  ;;  %1877 = vmatmul.msk.bf16.vlgmr.msrb.gmra.mxu1 %vm147_vm0, %v694_v22 }
 0x18e   :  { %1879 = vmatmul.msk.bf16.vlgmr.msrb.gmra.mxu2 %vm147_vm0, %v694_v22  ;;  %1880 = vmatmul.msk.bf16.vlgmr.msrb.gmra.mxu3 %vm147_vm0, %v694_v22 }
 0x18f   :  { %974 = vmatpush.bf16.msrb.mxu0 %v2348_v7  ;;  %1009 = vmatpush.bf16.msrb.mxu1 %v2350_v8 }
 0x190   :  { %1061 = vmatpush.bf16.msrb.mxu3 %v2355_v12  ;;  %1044 = vmatpush.bf16.msrb.mxu2 %v2352_v11 }
 0x193   :  { %975 = vmatpush.bf16.msrb.mxu0 %v2358_v13  ;;  %1010 = vmatpush.bf16.msrb.mxu1 %v2360_v14 }
 0x194   :  { %v2479_v23 = vld [vmem:[#allocation3 + $0x1] sm:$0x1]  ;;  %1045 = vmatpush.bf16.msrb.mxu2 %v2366_v15  ;;  %1062 = vmatpush.bf16.msrb.mxu3 %v2370_v16 }
 0x195   :  { %1526 = vst [vmem:[#allocation1] ss:$9 sm:$0xff] %v2479_v23 }
 0x20a   :  { %v711_v25 = vpop.f32.mrf.mxu0  ;;  %v746_v27 = vpop.f32.mrf.mxu1 }
 0x20b   :  { %v715_v28 = vadd.f32 %v711_v25, %v698_v24  ;;  %v750_v29 = vadd.f32 %v746_v27, %v736_v26 }
 0x20d   :  { %v1876_v30 = vmul.f32 -1.442695, %v715_v28  ;;  %v1878_v31 = vmul.f32 -1.442695, %v750_v29 }
 0x20f   :  { %1994 = vpow2.f32 %v1876_v30 }
 0x210   :  { %1996 = vpow2.f32 %v1878_v31 }
 0x211   :  { %v781_v32 = vpop.f32.mrf.mxu2  ;;  %v798_v34 = vpop.f32.mrf.mxu3 }
 0x212   :  { %v802_v35 = vadd.f32 %v798_v34, %v788_v33  ;;  %v713_v36 = vpop.f32.mrf.mxu0  ;;  %v748_v37 = vpop.f32.mrf.mxu1  ;;  %v785_v49 = vadd.f32 %v781_v32, %v771_v46 }
 0x214   :  { %v1881_v38 = vmul.f32 -1.442695, %v802_v35  ;;  %v869_v35 = vld [vmem:[#allocation2 + $0x16] sm:$0x3] }
 0x215   :  { %v1995_v39 = vpop.eup %1994 }
 0x216   :  { %v1997_v40 = vpop.eup %1996  ;;  %v719_v41 = vadd.f32 1.0, %v1995_v39  ;;  %1998 = vpow2.f32 %v1881_v38 }
 0x217   :  { %v754_v42 = vadd.f32 1.0, %v1997_v40 }
 0x218   :  { %2000 = vrcp.f32 %v719_v41  ;;  %v731_v55 = vand.u32 2147483648, %v719_v41  ;;  %v729_v58 = vand.u32 2147483647, %v719_v41  ;;  %vm725_vm15 = vweird.f32 %v719_v41 }
 0x219   :  { %2002 = vrcp.f32 %v754_v42  ;;  %v783_v43 = vpop.f32.mrf.mxu2  ;;  %v800_v44 = vpop.f32.mrf.mxu3  ;;  %v766_v56 = vand.u32 2147483648, %v754_v42  ;;  %v764_v61 = vand.u32 2147483647, %v754_v42  ;;  %vm760_vm1 = vweird.f32 %v754_v42 }
 0x21a   :  { %v732_v0 = vor.u32 1.1754944e-38, %v731_v55  ;;  %vm730_vm4 = vcmp.eq.f32.partialorder %v729_v58, 8.507059e+37  ;;  %v904_v55 = vld [vmem:[#allocation2 + $0x26] sm:$0x3] }
 0x21b   :  { %v767_v3 = vor.u32 1.1754944e-38, %v766_v56  ;;  %vm765_vm5 = vcmp.eq.f32.partialorder %v764_v61, 8.507059e+37 }
 0x21c   :  { %v1999_v45 = vpop.eup %1998 }
 0x21d   :  { %v806_v47 = vadd.f32 1.0, %v1999_v45 }
 0x21e   :  { %v2001_v48 = vpop.eup %2000 }
 0x21f   :  { %v2003_v50 = vpop.eup %2002  ;;  %v721_v51 = vmul.f32 %v2001_v48, %v719_v41  ;;  %2004 = vrcp.f32 %v806_v47  ;;  %vm726_vm12 = vweird.f32 %v2001_v48  ;;  %v818_v26 = vand.u32 2147483648, %v806_v47 }
 0x220   :  { %v756_v52 = vmul.f32 %v2003_v50, %v754_v42  ;;  %2006 = vtanh.f32 %v785_v49  ;;  %vm761_vm13 = vweird.f32 %v2003_v50  ;;  %vm727_vm2 = vmor %vm725_vm15, %vm726_vm12  ;;  %vm812_vm7 = vweird.f32 %v806_v47  ;;  %v921_v42 = vld [vmem:[#allocation2 + $0x36] sm:$0x3] }
 0x221   :  { %v722_v53 = vsub.f32 1.0, %v721_v51  ;;  %vm762_vm3 = vmor %vm760_vm1, %vm761_vm13  ;;  %v816_v27 = vand.u32 2147483647, %v806_v47  ;;  %v819_v29 = vor.u32 1.1754944e-38, %v818_v26 }
 0x222   :  { %v757_v54 = vsub.f32 1.0, %v756_v52 }
 0x223   :  { %v723_v57 = vmul.f32 %v2001_v48, %v722_v53  ;;  %vm817_vm9 = vcmp.eq.f32.partialorder %v816_v27, 8.507059e+37 }
 0x224   :  { %v758_v59 = vmul.f32 %v2003_v50, %v757_v54 }
 0x225   :  { %v2005_v62 = vpop.eup %2004  ;;  %v724_v63 = vadd.f32 %v2001_v48, %v723_v57 }
 0x226   :  { %v759_v1 = vadd.f32 %v2003_v50, %v758_v59  ;;  %v808_v2 = vmul.f32 %v2005_v62, %v806_v47  ;;  %v2007_v9 = vpop.eup %2006  ;;  %vm813_vm6 = vweird.f32 %v2005_v62 }
 0x227   :  { %v728_v5 = vsel %vm727_vm2, %v2001_v48, %v724_v63  ;;  %vm814_vm8 = vmor %vm812_vm7, %vm813_vm6 }
 0x228   :  { %v733_v10 = vsel %vm730_vm4, %v732_v0, %v728_v5  ;;  %v763_v17 = vsel %vm762_vm3, %v2003_v50, %v759_v1  ;;  %v809_v18 = vsub.f32 1.0, %v808_v2 }
 0x229   :  { %v768_v19 = vsel %vm765_vm5, %v767_v3, %v763_v17  ;;  %v823_v20 = vmul.f32 %v2007_v9, %v733_v10 }
 0x22a   :  { %v822_v21 = vmul.f32 %v768_v19, %v2463_v4  ;;  %v810_v22 = vmul.f32 %v2005_v62, %v809_v18  ;;  %v2499_v4 = vld [vmem:[#allocation1] sm:$0xf] }
 0x22c   :  { %v2485_v24 = vadd.f32 %v823_v20, %v822_v21  ;;  %v811_v25 = vadd.f32 %v2005_v62, %v810_v22 }
 0x22e   :  { %2008 = vtanh.f32 %v2485_v24  ;;  %v815_v28 = vsel %vm814_vm8, %v2005_v62, %v811_v25 }
 0x22f   :  { %v820_v31 = vsel %vm817_vm9, %v819_v29, %v815_v28 }
 0x234   :  { %v2009_v30 = vpop.eup %2008 }
 0x235   :  { %v826_v32 = vmul.f32 %v2009_v30, %v820_v31 }
 0x237   :  { %v827_v33 = vpack.c.bf16 %v826_v32, %v826_v32 }
 0x239   :  { %829 = vst.msk [vmem:[#allocation3 + $0x2] sm:$0x1] %vm562_vm14, %v827_v33  ;;  %1882 = vmatmul.msk.bf16.vlgmr.msra.gmra.mxu0 %vm147_vm0, %v827_v33  ;;  %1884 = vmatmul.msk.bf16.vlgmr.msra.gmra.mxu1 %vm147_vm0, %v827_v33 }
 0x23a   :  { %1886 = vmatmul.msk.bf16.vlgmr.msra.gmra.mxu2 %vm147_vm0, %v827_v33  ;;  %1887 = vmatmul.msk.bf16.vlgmr.msra.gmra.mxu3 %vm147_vm0, %v827_v33 }
 0x23b   :  { %1107 = vmatpush.bf16.msra.mxu0 %v2348_v7  ;;  %1142 = vmatpush.bf16.msra.mxu1 %v2350_v8  ;;  %v831_v7 = vld [vmem:[#allocation2 + $0x6] sm:$0x3] }
 0x23c   :  { %1194 = vmatpush.bf16.msra.mxu3 %v2355_v12  ;;  %1177 = vmatpush.bf16.msra.mxu2 %v2352_v11 }
 0x23f   :  { %1108 = vmatpush.bf16.msra.mxu0 %v2358_v13  ;;  %1143 = vmatpush.bf16.msra.mxu1 %v2360_v14 }
 0x240   :  { %v2501_v34 = vld [vmem:[#allocation3 + $0x2] sm:$0x1]  ;;  %1178 = vmatpush.bf16.msra.mxu2 %v2366_v15  ;;  %1195 = vmatpush.bf16.msra.mxu3 %v2370_v16 }
 0x241   :  { %1530 = vst [vmem:[#allocation1] ss:$9 sm:$0xff] %v2501_v34 }
 0x2b6   :  { %v844_v8 = vpop.f32.mrf.mxu0  ;;  %v879_v36 = vpop.f32.mrf.mxu1 }
 0x2b7   :  { %v848_v37 = vadd.f32 %v844_v8, %v831_v7  ;;  %v883_v38 = vadd.f32 %v879_v36, %v869_v35 }
 0x2b9   :  { %v1883_v39 = vmul.f32 -1.442695, %v848_v37  ;;  %v1885_v40 = vmul.f32 -1.442695, %v883_v38 }
 0x2bb   :  { %2010 = vpow2.f32 %v1883_v39 }
 0x2bc   :  { %2012 = vpow2.f32 %v1885_v40 }
 0x2bd   :  { %v914_v41 = vpop.f32.mrf.mxu2  ;;  %v931_v43 = vpop.f32.mrf.mxu3 }
 0x2be   :  { %v935_v44 = vadd.f32 %v931_v43, %v921_v42  ;;  %v846_v45 = vpop.f32.mrf.mxu0  ;;  %v881_v46 = vpop.f32.mrf.mxu1  ;;  %v918_v58 = vadd.f32 %v914_v41, %v904_v55  ;;  %v2518_v43 = vld [vmem:[#allocation14 + $0x18] sm:$0xff] }
 0x2bf   :  { %v964_v46 = vld [vmem:[#allocation2 + $0x8] sm:$0x3] }
 0x2c0   :  { %v1888_v47 = vmul.f32 -1.442695, %v935_v44  ;;  %v2525_v44 = vld [vmem:[#allocation1] sm:$0xf] }
 0x2c1   :  { %v2011_v48 = vpop.eup %2010 }
 0x2c2   :  { %v2013_v49 = vpop.eup %2012  ;;  %v852_v50 = vadd.f32 1.0, %v2011_v48  ;;  %2014 = vpow2.f32 %v1888_v47  ;;  %v1002_v48 = vld [vmem:[#allocation2 + $0x18] sm:$0x3] }
 0x2c3   :  { %v887_v51 = vadd.f32 1.0, %v2013_v49 }
 0x2c4   :  { %2016 = vrcp.f32 %v852_v50  ;;  %v864_v1 = vand.u32 2147483648, %v852_v50  ;;  %v862_v5 = vand.u32 2147483647, %v852_v50  ;;  %vm858_vm12 = vweird.f32 %v852_v50 }
 0x2c5   :  { %2018 = vrcp.f32 %v887_v51  ;;  %v916_v52 = vpop.f32.mrf.mxu2  ;;  %v933_v53 = vpop.f32.mrf.mxu3  ;;  %v899_v2 = vand.u32 2147483648, %v887_v51  ;;  %v897_v10 = vand.u32 2147483647, %v887_v51  ;;  %vm893_vm13 = vweird.f32 %v887_v51 }
 0x2c6   :  { %v865_v19 = vor.u32 1.1754944e-38, %v864_v1  ;;  %vm863_vm2 = vcmp.eq.f32.partialorder %v862_v5, 8.507059e+37 }
 0x2c7   :  { %v900_v22 = vor.u32 1.1754944e-38, %v899_v2  ;;  %vm898_vm3 = vcmp.eq.f32.partialorder %v897_v10, 8.507059e+37 }
 0x2c8   :  { %v2015_v54 = vpop.eup %2014 }
 0x2c9   :  { %v939_v56 = vadd.f32 1.0, %v2015_v54 }
 0x2ca   :  { %v2017_v57 = vpop.eup %2016 }
 0x2cb   :  { %v2019_v59 = vpop.eup %2018  ;;  %v854_v61 = vmul.f32 %v2017_v57, %v852_v50  ;;  %2020 = vrcp.f32 %v939_v56  ;;  %vm859_vm10 = vweird.f32 %v2017_v57  ;;  %v951_v35 = vand.u32 2147483648, %v939_v56 }
 0x2cc   :  { %v889_v62 = vmul.f32 %v2019_v59, %v887_v51  ;;  %2022 = vtanh.f32 %v918_v58  ;;  %vm894_vm11 = vweird.f32 %v2019_v59  ;;  %vm860_vm15 = vmor %vm858_vm12, %vm859_vm10  ;;  %vm945_vm5 = vweird.f32 %v939_v56  ;;  %v1054_v51 = vld [vmem:[#allocation2 + $0x38] sm:$0x3] }
 0x2cd   :  { %v855_v63 = vsub.f32 1.0, %v854_v61  ;;  %vm895_vm1 = vmor %vm893_vm13, %vm894_vm11  ;;  %v949_v36 = vand.u32 2147483647, %v939_v56  ;;  %v952_v38 = vor.u32 1.1754944e-38, %v951_v35 }
 0x2ce   :  { %v890_v0 = vsub.f32 1.0, %v889_v62 }
 0x2cf   :  { %v856_v3 = vmul.f32 %v2017_v57, %v855_v63  ;;  %vm950_vm7 = vcmp.eq.f32.partialorder %v949_v36, 8.507059e+37  ;;  %v1037_v63 = vld [vmem:[#allocation2 + $0x28] sm:$0x3] }
 0x2d0   :  { %v891_v9 = vmul.f32 %v2019_v59, %v890_v0 }
 0x2d1   :  { %v2021_v17 = vpop.eup %2020  ;;  %v857_v18 = vadd.f32 %v2017_v57, %v856_v3 }
 0x2d2   :  { %v892_v20 = vadd.f32 %v2019_v59, %v891_v9  ;;  %v941_v21 = vmul.f32 %v2021_v17, %v939_v56  ;;  %v2023_v26 = vpop.eup %2022  ;;  %vm946_vm4 = vweird.f32 %v2021_v17 }
 0x2d3   :  { %v861_v25 = vsel %vm860_vm15, %v2017_v57, %v857_v18  ;;  %vm947_vm6 = vmor %vm945_vm5, %vm946_vm4 }
 0x2d4   :  { %v866_v27 = vsel %vm863_vm2, %v865_v19, %v861_v25  ;;  %v896_v28 = vsel %vm895_vm1, %v2019_v59, %v892_v20  ;;  %v942_v29 = vsub.f32 1.0, %v941_v21 }
 0x2d5   :  { %v901_v30 = vsel %vm898_vm3, %v900_v22, %v896_v28  ;;  %v956_v31 = vmul.f32 %v2023_v26, %v866_v27 }
 0x2d6   :  { %v955_v32 = vmul.f32 %v901_v30, %v2485_v24  ;;  %v943_v33 = vmul.f32 %v2021_v17, %v942_v29  ;;  %v2515_v24 = vld [vmem:[#allocation14 + $0x8] sm:$0xff] }
 0x2d8   :  { %v2507_v7 = vadd.f32 %v956_v31, %v955_v32  ;;  %v944_v8 = vadd.f32 %v2021_v17, %v943_v33 }
 0x2da   :  { %2024 = vtanh.f32 %v2507_v7  ;;  %v948_v37 = vsel %vm947_vm6, %v2021_v17, %v944_v8 }
 0x2db   :  { %v953_v40 = vsel %vm950_vm7, %v952_v38, %v948_v37 }
 0x2e0   :  { %v2025_v39 = vpop.eup %2024 }
 0x2e1   :  { %v959_v41 = vmul.f32 %v2025_v39, %v953_v40 }
 0x2e3   :  { %v960_v42 = vpack.c.bf16 %v959_v41, %v959_v41 }
 0x2e5   :  { %962 = vst.msk [vmem:[#allocation3 + $0x3] sm:$0x1] %vm562_vm14, %v960_v42  ;;  %1889 = vmatmul.msk.bf16.vlgmr.msrb.gmra.mxu0 %vm147_vm0, %v960_v42  ;;  %1891 = vmatmul.msk.bf16.vlgmr.msrb.gmra.mxu1 %vm147_vm0, %v960_v42 }
 0x2e6   :  { %1893 = vmatmul.msk.bf16.vlgmr.msrb.gmra.mxu2 %vm147_vm0, %v960_v42  ;;  %1894 = vmatmul.msk.bf16.vlgmr.msrb.gmra.mxu3 %vm147_vm0, %v960_v42 }
 0x2e7   :  { %1240 = vmatpush.bf16.msrb.mxu0 %v2515_v24  ;;  %1275 = vmatpush.bf16.msrb.mxu1 %v2518_v43 }
 0x2e8   :  { %1327 = vmatpush.bf16.msrb.mxu3 %v2355_v12  ;;  %1310 = vmatpush.bf16.msrb.mxu2 %v2352_v11 }
 0x2eb   :  { %1241 = vmatpush.bf16.msrb.mxu0 %v2358_v13  ;;  %1276 = vmatpush.bf16.msrb.mxu1 %v2360_v14 }
 0x2ec   :  { %v2527_v45 = vld [vmem:[#allocation3 + $0x3] sm:$0x1]  ;;  %1311 = vmatpush.bf16.msrb.mxu2 %v2366_v15  ;;  %1328 = vmatpush.bf16.msrb.mxu3 %v2370_v16 }
 0x2ed   :  { %1534 = vst [vmem:[#allocation1] ss:$9 sm:$0xff] %v2527_v45 }
 0x362   :  { %v977_v47 = vpop.f32.mrf.mxu0  ;;  %v1012_v12 = vpop.f32.mrf.mxu1 }
 0x363   :  { %v981_v49 = vadd.f32 %v977_v47, %v964_v46  ;;  %v1016_v11 = vadd.f32 %v1012_v12, %v1002_v48 }
 0x365   :  { %v1890_v50 = vmul.f32 -1.442695, %v981_v49  ;;  %v1892_v13 = vmul.f32 -1.442695, %v1016_v11 }
 0x367   :  { %2026 = vpow2.f32 %v1890_v50 }
 0x368   :  { %2028 = vpow2.f32 %v1892_v13 }
 0x369   :  { %v1047_v14 = vpop.f32.mrf.mxu2  ;;  %v1064_v52 = vpop.f32.mrf.mxu3 }
 0x36a   :  { %v1068_v53 = vadd.f32 %v1064_v52, %v1054_v51  ;;  %v979_v54 = vpop.f32.mrf.mxu0  ;;  %v1014_v15 = vpop.f32.mrf.mxu1  ;;  %v1051_v2 = vadd.f32 %v1047_v14, %v1037_v63  ;;  %v2101_v14 = vld [vmem:[#allocation14 + $0x28] sm:$0xff]  ;;  %v2102_v51 = vld [vmem:[#allocation14] sm:$0xff]  ;;  %v2103_v52 = vld [vmem:[#allocation14 + $0x10] sm:$0xff] }
 0x36b   :  { %v2104_v15 = vld [vmem:[#allocation14 + $0x20] sm:$0xff]  ;;  %v1187_v63 = vld [vmem:[#allocation2 + $0x3a] sm:$0x3] }
 0x36c   :  { %v1895_v55 = vmul.f32 -1.442695, %v1068_v53  ;;  %v2543_v53 = vld [vmem:[#allocation1] sm:$0xf] }
 0x36d   :  { %v2027_v16 = vpop.eup %2026 }
 0x36e   :  { %v2029_v56 = vpop.eup %2028  ;;  %v985_v57 = vadd.f32 1.0, %v2027_v16  ;;  %2030 = vpow2.f32 %v1895_v55  ;;  %v2105_v55 = vld [vmem:[#allocation14 + $0x30] sm:$0xff]  ;;  %v1135_v16 = vld [vmem:[#allocation2 + $0x1a] sm:$0x3] }
 0x36f   :  { %v1020_v58 = vadd.f32 1.0, %v2029_v56 }
 0x370   :  { %2032 = vrcp.f32 %v985_v57  ;;  %v997_v18 = vand.u32 2147483648, %v985_v57  ;;  %v995_v21 = vand.u32 2147483647, %v985_v57  ;;  %vm991_vm10 = vweird.f32 %v985_v57 }
 0x371   :  { %2034 = vrcp.f32 %v1020_v58  ;;  %v1049_v59 = vpop.f32.mrf.mxu2  ;;  %v1066_v61 = vpop.f32.mrf.mxu3  ;;  %v1032_v19 = vand.u32 2147483648, %v1020_v58  ;;  %v1030_v25 = vand.u32 2147483647, %v1020_v58  ;;  %vm1026_vm11 = vweird.f32 %v1020_v58 }
 0x372   :  { %v998_v28 = vor.u32 1.1754944e-38, %v997_v18  ;;  %vm996_vm15 = vcmp.eq.f32.partialorder %v995_v21, 8.507059e+37 }
 0x373   :  { %v1033_v31 = vor.u32 1.1754944e-38, %v1032_v19  ;;  %vm1031_vm1 = vcmp.eq.f32.partialorder %v1030_v25, 8.507059e+37 }
 0x374   :  { %v2031_v62 = vpop.eup %2030 }
 0x375   :  { %v1072_v0 = vadd.f32 1.0, %v2031_v62 }
 0x376   :  { %v2033_v1 = vpop.eup %2032 }
 0x377   :  { %v2035_v3 = vpop.eup %2034  ;;  %v987_v5 = vmul.f32 %v2033_v1, %v985_v57  ;;  %2036 = vrcp.f32 %v1072_v0  ;;  %vm992_vm8 = vweird.f32 %v2033_v1  ;;  %v1084_v46 = vand.u32 2147483648, %v1072_v0 }
 0x378   :  { %v1022_v9 = vmul.f32 %v2035_v3, %v1020_v58  ;;  %2038 = vtanh.f32 %v1051_v2  ;;  %vm1027_vm9 = vweird.f32 %v2035_v3  ;;  %vm993_vm12 = vmor %vm991_vm10, %vm992_vm8  ;;  %vm1078_vm3 = vweird.f32 %v1072_v0 }
 0x379   :  { %v988_v10 = vsub.f32 1.0, %v987_v5  ;;  %vm1028_vm13 = vmor %vm1026_vm11, %vm1027_vm9  ;;  %v1082_v47 = vand.u32 2147483647, %v1072_v0  ;;  %v1085_v12 = vor.u32 1.1754944e-38, %v1084_v46 }
 0x37a   :  { %v1023_v17 = vsub.f32 1.0, %v1022_v9 }
 0x37b   :  { %v989_v20 = vmul.f32 %v2033_v1, %v988_v10  ;;  %vm1083_vm5 = vcmp.eq.f32.partialorder %v1082_v47, 8.507059e+37 }
 0x37c   :  { %v1024_v22 = vmul.f32 %v2035_v3, %v1023_v17 }
 0x37d   :  { %v2037_v26 = vpop.eup %2036  ;;  %v990_v27 = vadd.f32 %v2033_v1, %v989_v20 }
 0x37e   :  { %v1025_v29 = vadd.f32 %v2035_v3, %v1024_v22  ;;  %v1074_v30 = vmul.f32 %v2037_v26, %v1072_v0  ;;  %v2039_v33 = vpop.eup %2038  ;;  %vm1079_vm2 = vweird.f32 %v2037_v26  ;;  %v1170_v22 = vld [vmem:[#allocation2 + $0x2a] sm:$0x3] }
 0x37f   :  { %v994_v32 = vsel %vm993_vm12, %v2033_v1, %v990_v27  ;;  %vm1080_vm4 = vmor %vm1078_vm3, %vm1079_vm2 }
 0x380   :  { %v999_v8 = vsel %vm996_vm15, %v998_v28, %v994_v32  ;;  %v1029_v35 = vsel %vm1028_vm13, %v2035_v3, %v1025_v29  ;;  %v1075_v36 = vsub.f32 1.0, %v1074_v30 }
 0x381   :  { %v1034_v37 = vsel %vm1031_vm1, %v1033_v31, %v1029_v35  ;;  %v1089_v38 = vmul.f32 %v2039_v33, %v999_v8 }
 0x382   :  { %v1088_v39 = vmul.f32 %v1034_v37, %v2507_v7  ;;  %v1076_v40 = vmul.f32 %v2037_v26, %v1075_v36  ;;  %v2100_v7 = vld [vmem:[#allocation14 + $0x38] sm:$0xff] }
 0x384   :  { %v2533_v41 = vadd.f32 %v1089_v38, %v1088_v39  ;;  %v1077_v42 = vadd.f32 %v2037_v26, %v1076_v40 }
 0x386   :  { %2040 = vtanh.f32 %v2533_v41  ;;  %v1081_v48 = vsel %vm1080_vm4, %v2037_v26, %v1077_v42 }
 0x387   :  { %v1086_v11 = vsel %vm1083_vm5, %v1085_v12, %v1081_v48 }
 0x38c   :  { %v2041_v49 = vpop.eup %2040 }
 0x38d   :  { %v1092_v50 = vmul.f32 %v2041_v49, %v1086_v11 }
 0x38f   :  { %v1093_v13 = vpack.c.bf16 %v1092_v50, %v1092_v50 }
 0x391   :  { %1095 = vst.msk [vmem:[#allocation3 + $0x4] sm:$0x1] %vm562_vm14, %v1093_v13  ;;  %1896 = vmatmul.msk.bf16.vlgmr.msra.gmra.mxu0 %vm147_vm0, %v1093_v13  ;;  %1898 = vmatmul.msk.bf16.vlgmr.msra.gmra.mxu1 %vm147_vm0, %v1093_v13 }
 0x392   :  { %1900 = vmatmul.msk.bf16.vlgmr.msra.gmra.mxu2 %vm147_vm0, %v1093_v13  ;;  %1901 = vmatmul.msk.bf16.vlgmr.msra.gmra.mxu3 %vm147_vm0, %v1093_v13 }
 0x393   :  { %1373 = vmatpush.bf16.msra.mxu0 %v2515_v24  ;;  %1408 = vmatpush.bf16.msra.mxu1 %v2518_v43  ;;  %v1097_v24 = vld [vmem:[#allocation2 + $0xa] sm:$0x3] }
 0x394   :  { %1460 = vmatpush.bf16.msra.mxu3 %v2100_v7  ;;  %1443 = vmatpush.bf16.msra.mxu2 %v2101_v14 }
 0x397   :  { %1374 = vmatpush.bf16.msra.mxu0 %v2102_v51  ;;  %1409 = vmatpush.bf16.msra.mxu1 %v2103_v52 }
 0x398   :  { %v2545_v54 = vld [vmem:[#allocation3 + $0x4] sm:$0x1]  ;;  %1444 = vmatpush.bf16.msra.mxu2 %v2104_v15  ;;  %1461 = vmatpush.bf16.msra.mxu3 %v2105_v55 }
 0x399   :  { %1538 = vst [vmem:[#allocation1] ss:$9 sm:$0xff] %v2545_v54 }
 0x40e   :  { %v1110_v43 = vpop.f32.mrf.mxu0  ;;  %v1145_v56 = vpop.f32.mrf.mxu1 }
 0x40f   :  { %v1114_v57 = vadd.f32 %v1110_v43, %v1097_v24  ;;  %v1149_v58 = vadd.f32 %v1145_v56, %v1135_v16 }
 0x411   :  { %v1897_v59 = vmul.f32 -1.442695, %v1114_v57  ;;  %v1899_v61 = vmul.f32 -1.442695, %v1149_v58 }
 0x413   :  { %2042 = vpow2.f32 %v1897_v59 }
 0x414   :  { %2044 = vpow2.f32 %v1899_v61 }
 0x415   :  { %v1180_v62 = vpop.f32.mrf.mxu2  ;;  %v1197_v0 = vpop.f32.mrf.mxu3 }
 0x416   :  { %v1201_v1 = vadd.f32 %v1197_v0, %v1187_v63  ;;  %v1112_v2 = vpop.f32.mrf.mxu0  ;;  %v1147_v3 = vpop.f32.mrf.mxu1  ;;  %v1184_v27 = vadd.f32 %v1180_v62, %v1170_v22  ;;  %v2559_v62 = vld [vmem:[#allocation1] sm:$0xf]  ;;  %v1230_v63 = vld [vmem:[#allocation2 + $0xc] sm:$0x3] }
 0x418   :  { %v1902_v5 = vmul.f32 -1.442695, %v1201_v1  ;;  %v1268_v1 = vld [vmem:[#allocation2 + $0x1c] sm:$0x3] }
 0x419   :  { %v2043_v9 = vpop.eup %2042 }
 0x41a   :  { %v2045_v10 = vpop.eup %2044  ;;  %v1118_v17 = vadd.f32 1.0, %v2043_v9  ;;  %2046 = vpow2.f32 %v1902_v5 }
 0x41b   :  { %v1153_v18 = vadd.f32 1.0, %v2045_v10 }
 0x41c   :  { %2048 = vrcp.f32 %v1118_v17  ;;  %v1130_v33 = vand.u32 2147483648, %v1118_v17  ;;  %v1128_v36 = vand.u32 2147483647, %v1118_v17  ;;  %vm1124_vm8 = vweird.f32 %v1118_v17 }
 0x41d   :  { %2050 = vrcp.f32 %v1153_v18  ;;  %v1182_v19 = vpop.f32.mrf.mxu2  ;;  %v1199_v20 = vpop.f32.mrf.mxu3  ;;  %v1165_v8 = vand.u32 2147483648, %v1153_v18  ;;  %v1163_v38 = vand.u32 2147483647, %v1153_v18  ;;  %vm1159_vm9 = vweird.f32 %v1153_v18 }
 0x41e   :  { %v1131_v42 = vor.u32 1.1754944e-38, %v1130_v33  ;;  %vm1129_vm12 = vcmp.eq.f32.partialorder %v1128_v36, 8.507059e+37  ;;  %v1303_v33 = vld [vmem:[#allocation2 + $0x2c] sm:$0x3] }
 0x41f   :  { %v1166_v48 = vor.u32 1.1754944e-38, %v1165_v8  ;;  %vm1164_vm13 = vcmp.eq.f32.partialorder %v1163_v38, 8.507059e+37 }
 0x420   :  { %v2047_v21 = vpop.eup %2046 }
 0x421   :  { %v1205_v25 = vadd.f32 1.0, %v2047_v21 }
 0x422   :  { %v2049_v26 = vpop.eup %2048 }
 0x423   :  { %v2051_v28 = vpop.eup %2050  ;;  %v1120_v29 = vmul.f32 %v2049_v26, %v1118_v17  ;;  %2052 = vrcp.f32 %v1205_v25  ;;  %vm1125_vm6 = vweird.f32 %v2049_v26  ;;  %v1217_v24 = vand.u32 2147483648, %v1205_v25 }
 0x424   :  { %v1155_v30 = vmul.f32 %v2051_v28, %v1153_v18  ;;  %2054 = vtanh.f32 %v1184_v27  ;;  %vm1160_vm7 = vweird.f32 %v2051_v28  ;;  %vm1126_vm10 = vmor %vm1124_vm8, %vm1125_vm6  ;;  %vm1211_vm1 = vweird.f32 %v1205_v25  ;;  %v1320_v18 = vld [vmem:[#allocation2 + $0x3c] sm:$0x3] }
 0x425   :  { %v1121_v31 = vsub.f32 1.0, %v1120_v29  ;;  %vm1161_vm11 = vmor %vm1159_vm9, %vm1160_vm7  ;;  %v1215_v43 = vand.u32 2147483647, %v1205_v25  ;;  %v1218_v56 = vor.u32 1.1754944e-38, %v1217_v24 }
 0x426   :  { %v1156_v32 = vsub.f32 1.0, %v1155_v30 }
 0x427   :  { %v1122_v35 = vmul.f32 %v2049_v26, %v1121_v31  ;;  %vm1216_vm3 = vcmp.eq.f32.partialorder %v1215_v43, 8.507059e+37 }
 0x428   :  { %v1157_v37 = vmul.f32 %v2051_v28, %v1156_v32 }
 0x429   :  { %v2053_v39 = vpop.eup %2052  ;;  %v1123_v40 = vadd.f32 %v2049_v26, %v1122_v35 }
 0x42a   :  { %v1158_v46 = vadd.f32 %v2051_v28, %v1157_v37  ;;  %v1207_v47 = vmul.f32 %v2053_v39, %v1205_v25  ;;  %v2055_v49 = vpop.eup %2054  ;;  %vm1212_vm15 = vweird.f32 %v2053_v39 }
 0x42b   :  { %v1127_v12 = vsel %vm1126_vm10, %v2049_v26, %v1123_v40  ;;  %vm1213_vm2 = vmor %vm1211_vm1, %vm1212_vm15 }
 0x42c   :  { %v1132_v11 = vsel %vm1129_vm12, %v1131_v42, %v1127_v12  ;;  %v1162_v50 = vsel %vm1161_vm11, %v2051_v28, %v1158_v46  ;;  %v1208_v13 = vsub.f32 1.0, %v1207_v47 }
 0x42d   :  { %v1167_v7 = vsel %vm1164_vm13, %v1166_v48, %v1162_v50  ;;  %v1222_v14 = vmul.f32 %v2055_v49, %v1132_v11 }
 0x42e   :  { %v1221_v51 = vmul.f32 %v1167_v7, %v2533_v41  ;;  %v1209_v52 = vmul.f32 %v2053_v39, %v1208_v13 }
 0x430   :  { %v2549_v15 = vadd.f32 %v1222_v14, %v1221_v51  ;;  %v1210_v55 = vadd.f32 %v2053_v39, %v1209_v52 }
 0x432   :  { %2056 = vtanh.f32 %v2549_v15  ;;  %v1214_v16 = vsel %vm1213_vm2, %v2053_v39, %v1210_v55 }
 0x433   :  { %v1219_v58 = vsel %vm1216_vm3, %v1218_v56, %v1214_v16 }
 0x438   :  { %v2057_v57 = vpop.eup %2056 }
 0x439   :  { %v1225_v59 = vmul.f32 %v2057_v57, %v1219_v58 }
 0x43b   :  { %v1226_v61 = vpack.c.bf16 %v1225_v59, %v1225_v59 }
 0x43d   :  { %1228 = vst.msk [vmem:[#allocation3 + $0x5] sm:$0x1] %vm562_vm14, %v1226_v61  ;;  %1903 = vmatmul.msk.bf16.vlgmr.msrb.gmra.mxu0 %vm147_vm0, %v1226_v61  ;;  %1905 = vmatmul.msk.bf16.vlgmr.msrb.gmra.mxu1 %vm147_vm0, %v1226_v61 }
 0x43e   :  { %1907 = vmatmul.msk.bf16.vlgmr.msrb.gmra.mxu2 %vm147_vm0, %v1226_v61  ;;  %1908 = vmatmul.msk.bf16.vlgmr.msrb.gmra.mxu3 %vm147_vm0, %v1226_v61 }
 0x444   :  { %v2557_v41 = vld [vmem:[#allocation3 + $0x5] sm:$0x1] }
 0x445   :  { %1542 = vst [vmem:[#allocation1] ss:$9 sm:$0xff] %v2557_v41 }
 0x4ba   :  { %v1243_v0 = vpop.f32.mrf.mxu0  ;;  %v1278_v2 = vpop.f32.mrf.mxu1 }
 0x4bb   :  { %v1247_v3 = vadd.f32 %v1243_v0, %v1230_v63  ;;  %v1282_v5 = vadd.f32 %v1278_v2, %v1268_v1 }
 0x4bd   :  { %v1904_v9 = vmul.f32 -1.442695, %v1247_v3  ;;  %v1906_v10 = vmul.f32 -1.442695, %v1282_v5 }
 0x4bf   :  { %2058 = vpow2.f32 %v1904_v9 }
 0x4c0   :  { %2060 = vpow2.f32 %v1906_v10 }
 0x4c1   :  { %v1313_v17 = vpop.f32.mrf.mxu2  ;;  %v1330_v19 = vpop.f32.mrf.mxu3 }
 0x4c2   :  { %v1334_v20 = vadd.f32 %v1330_v19, %v1320_v18  ;;  %v1245_v21 = vpop.f32.mrf.mxu0  ;;  %v1280_v22 = vpop.f32.mrf.mxu1  ;;  %v1317_v36 = vadd.f32 %v1313_v17, %v1303_v33  ;;  %v2573_v19 = vld [vmem:[#allocation1] sm:$0xf] }
 0x4c3   :  { %v1401_v22 = vld [vmem:[#allocation2 + $0x1e] sm:$0x3] }
 0x4c4   :  { %v1909_v25 = vmul.f32 -1.442695, %v1334_v20  ;;  %v1363_v20 = vld [vmem:[#allocation2 + $0xe] sm:$0x3] }
 0x4c5   :  { %v2059_v26 = vpop.eup %2058 }
 0x4c6   :  { %v2061_v27 = vpop.eup %2060  ;;  %v1251_v28 = vadd.f32 1.0, %v2059_v26  ;;  %2062 = vpow2.f32 %v1909_v25 }
 0x4c7   :  { %v1286_v29 = vadd.f32 1.0, %v2061_v27 }
 0x4c8   :  { %2064 = vrcp.f32 %v1251_v28  ;;  %v1263_v46 = vand.u32 2147483648, %v1251_v28  ;;  %v1261_v12 = vand.u32 2147483647, %v1251_v28  ;;  %vm1257_vm6 = vweird.f32 %v1251_v28 }
 0x4c9   :  { %2066 = vrcp.f32 %v1286_v29  ;;  %v1315_v30 = vpop.f32.mrf.mxu2  ;;  %v1332_v31 = vpop.f32.mrf.mxu3  ;;  %v1298_v47 = vand.u32 2147483648, %v1286_v29  ;;  %v1296_v11 = vand.u32 2147483647, %v1286_v29  ;;  %vm1292_vm7 = vweird.f32 %v1286_v29 }
 0x4ca   :  { %v1264_v7 = vor.u32 1.1754944e-38, %v1263_v46  ;;  %vm1262_vm10 = vcmp.eq.f32.partialorder %v1261_v12, 8.507059e+37  ;;  %v1453_v31 = vld [vmem:[#allocation2 + $0x3e] sm:$0x3]  ;;  %v1504_v12 = vld [vmem:[#allocation9 + $0x2] sm:$0x3] }
 0x4cb   :  { %v1299_v52 = vor.u32 1.1754944e-38, %v1298_v47  ;;  %vm1297_vm11 = vcmp.eq.f32.partialorder %v1296_v11, 8.507059e+37 }
 0x4cc   :  { %v2063_v32 = vpop.eup %2062 }
 0x4cd   :  { %v1338_v8 = vadd.f32 1.0, %v2063_v32 }
 0x4ce   :  { %v2065_v35 = vpop.eup %2064 }
 0x4cf   :  { %v2067_v37 = vpop.eup %2066  ;;  %v1253_v38 = vmul.f32 %v2065_v35, %v1251_v28  ;;  %2068 = vrcp.f32 %v1338_v8  ;;  %vm1258_vm4 = vweird.f32 %v2065_v35  ;;  %v1350_v1 = vand.u32 2147483648, %v1338_v8 }
 0x4d0   :  { %v1288_v39 = vmul.f32 %v2067_v37, %v1286_v29  ;;  %2070 = vtanh.f32 %v1317_v36  ;;  %vm1293_vm5 = vweird.f32 %v2067_v37  ;;  %vm1259_vm8 = vmor %vm1257_vm6, %vm1258_vm4  ;;  %vm1344_vm13 = vweird.f32 %v1338_v8 }
 0x4d1   :  { %v1254_v40 = vsub.f32 1.0, %v1253_v38  ;;  %vm1294_vm9 = vmor %vm1292_vm7, %vm1293_vm5  ;;  %v1348_v2 = vand.u32 2147483647, %v1338_v8  ;;  %v1351_v5 = vor.u32 1.1754944e-38, %v1350_v1  ;;  %vm1562_vm6 = vcmask 1041409  }
 0x4d2   :  { %v1289_v42 = vsub.f32 1.0, %v1288_v39  ;;  %vm1565_vm7 = vcmask 1042434  }
 0x4d3   :  { %v1255_v48 = vmul.f32 %v2065_v35, %v1254_v40  ;;  %vm1349_vm1 = vcmp.eq.f32.partialorder %v1348_v2, 8.507059e+37 }
 0x4d4   :  { %v1290_v49 = vmul.f32 %v2067_v37, %v1289_v42  ;;  %v1436_v42 = vld [vmem:[#allocation2 + $0x2e] sm:$0x3] }
 0x4d5   :  { %v2069_v50 = vpop.eup %2068  ;;  %v1256_v13 = vadd.f32 %v2065_v35, %v1255_v48 }
 0x4d6   :  { %v1291_v14 = vadd.f32 %v2067_v37, %v1290_v49  ;;  %v1340_v51 = vmul.f32 %v2069_v50, %v1338_v8  ;;  %v2071_v24 = vpop.eup %2070  ;;  %vm1345_vm12 = vweird.f32 %v2069_v50 }
 0x4d7   :  { %v1260_v55 = vsel %vm1259_vm8, %v2065_v35, %v1256_v13  ;;  %vm1346_vm15 = vmor %vm1344_vm13, %vm1345_vm12  ;;  %v1512_v13 = vpack.c.bf16 %v1504_v12, %v1504_v12  ;;  %vm1571_vm13 = vcmask 1044484  }
 0x4d8   :  { %v1265_v43 = vsel %vm1262_vm10, %v1264_v7, %v1260_v55  ;;  %v1295_v16 = vsel %vm1294_vm9, %v2067_v37, %v1291_v14  ;;  %v1341_v56 = vsub.f32 1.0, %v1340_v51  ;;  %v1503_v14 = vld [vmem:[#allocation9] sm:$0x3]  ;;  %v1506_v51 = vld [vmem:[#allocation9 + $0x6] sm:$0x3]  ;;  %vm1568_vm9 = vcmask 1043459  }
 0x4d9   :  { %v1300_v57 = vsel %vm1297_vm11, %v1299_v52, %v1295_v16  ;;  %v1355_v58 = vmul.f32 %v2071_v24, %v1265_v43  ;;  %v1507_v24 = vld [vmem:[#allocation9 + $0x8] sm:$0x3]  ;;  %v1514_v16 = vpack.c.bf16 %v1506_v51, %v1506_v51  ;;  %v2590_v2 = vunpack.c.l.b16 %v1512_v13 }
 0x4da   :  { %v1354_v59 = vmul.f32 %v1300_v57, %v2549_v15  ;;  %v1342_v61 = vmul.f32 %v2069_v50, %v1341_v56  ;;  %v1508_v57 = vld [vmem:[#allocation9 + $0xa] sm:$0x3]  ;;  %v1515_v1 = vpack.c.bf16 %v1507_v24, %v1507_v24 }
 0x4dc   :  { %v2563_v63 = vadd.f32 %v1355_v58, %v1354_v59  ;;  %v1343_v0 = vadd.f32 %v2069_v50, %v1342_v61  ;;  %v1511_v58 = vpack.c.bf16 %v1503_v14, %v1503_v14 }
 0x4de   :  { %2072 = vtanh.f32 %v2563_v63  ;;  %v1347_v3 = vsel %vm1346_vm15, %v2069_v50, %v1343_v0  ;;  %v1505_v50 = vld [vmem:[#allocation9 + $0x4] sm:$0x3]  ;;  %v1509_v0 = vld [vmem:[#allocation9 + $0xc] sm:$0x3]  ;;  %vm1574_vm15 = vcmask 1045509  }
 0x4df   :  { %v1352_v10 = vsel %vm1349_vm1, %v1351_v5, %v1347_v3  ;;  %v1513_v43 = vpack.c.bf16 %v1505_v50, %v1505_v50  ;;  %vm1580_vm1 = vcmask 1047559  }
 0x4e4   :  { %v2073_v9 = vpop.eup %2072 }
 0x4e5   :  { %v1358_v17 = vmul.f32 %v2073_v9, %v1352_v10 }
 0x4e7   :  { %v1359_v18 = vpack.c.bf16 %v1358_v17, %v1358_v17  ;;  %v1510_v17 = vld [vmem:[#allocation9 + $0xe] sm:$0x3] }
 0x4e9   :  { %1361 = vst.msk [vmem:[#allocation3 + $0x6] sm:$0x1] %vm562_vm14, %v1359_v18  ;;  %1910 = vmatmul.msk.bf16.vlgmr.msra.gmra.mxu0 %vm147_vm0, %v1359_v18  ;;  %1912 = vmatmul.msk.bf16.vlgmr.msra.gmra.mxu1 %vm147_vm0, %v1359_v18 }
 0x4ea   :  { %1914 = vmatmul.msk.bf16.vlgmr.msra.gmra.mxu2 %vm147_vm0, %v1359_v18  ;;  %1915 = vmatmul.msk.bf16.vlgmr.msra.gmra.mxu3 %vm147_vm0, %v1359_v18  ;;  %v1516_v18 = vpack.c.bf16 %v1508_v57, %v1508_v57 }
 0x4f0   :  { %v2571_v15 = vld [vmem:[#allocation3 + $0x6] sm:$0x1] }
 0x4f1   :  { %1546 = vst [vmem:[#allocation1] ss:$9 sm:$0xff] %v2571_v15 }
 0x566   :  { %v1376_v21 = vpop.f32.mrf.mxu0  ;;  %v1411_v25 = vpop.f32.mrf.mxu1 }
 0x567   :  { %v1380_v26 = vadd.f32 %v1376_v21, %v1363_v20  ;;  %v1415_v27 = vadd.f32 %v1411_v25, %v1401_v22  ;;  %v2603_v22 = vunpack.c.l.b16 %v1513_v43  ;;  %v2605_v25 = vunpack.c.l.b16 %v1514_v16 }
 0x569   :  { %v1911_v28 = vmul.f32 -1.442695, %v1380_v26  ;;  %v1913_v29 = vmul.f32 -1.442695, %v1415_v27  ;;  %v1517_v27 = vpack.c.bf16 %v1509_v0, %v1509_v0 }
 0x56b   :  { %2074 = vpow2.f32 %v1911_v28  ;;  %v1518_v28 = vpack.c.bf16 %v1510_v17, %v1510_v17 }
 0x56c   :  { %2076 = vpow2.f32 %v1913_v29  ;;  %v1591_v29 = vunpack.c.l.b16 %v1511_v58 }
 0x56d   :  { %v1446_v30 = vpop.f32.mrf.mxu2  ;;  %v1463_v32 = vpop.f32.mrf.mxu3 }
 0x56e   :  { %v1467_v33 = vadd.f32 %v1463_v32, %v1453_v31  ;;  %v1378_v8 = vpop.f32.mrf.mxu0  ;;  %v1413_v35 = vpop.f32.mrf.mxu1  ;;  %v1450_v46 = vadd.f32 %v1446_v30, %v1436_v42  ;;  %v1595_v31 = vunpack.c.l.b16 %v1515_v1  ;;  %v1918_v32 = vunpack.i.l.s16 %v2590_v2 }
 0x56f   :  { %v1596_v35 = vunpack.c.l.b16 %v1516_v18  ;;  %v1919_v42 = vunpack.i.l.s16 %v2603_v22  ;;  %v1917_v12 = vunpack.i.l.s16 %v1591_v29 }
 0x570   :  { %v1916_v36 = vmul.f32 -1.442695, %v1467_v33 }
 0x571   :  { %v2075_v37 = vpop.eup %2074  ;;  %v1713_v29 = vrot.slane %v1917_v12, 1 }
 0x572   :  { %v2077_v38 = vpop.eup %2076  ;;  %v2576_v39 = vadd.f32 1.0, %v2075_v37  ;;  %2078 = vpow2.f32 %v1916_v36  ;;  %v2608_v36 = vunpack.c.l.b16 %v1517_v27  ;;  %v2610_v37 = vunpack.c.l.b16 %v1518_v28 }
 0x573   :  { %v2578_v40 = vadd.f32 1.0, %v2077_v38 }
 0x574   :  { %2080 = vrcp.f32 %v2576_v39  ;;  %v1394_v49 = vand.u32 2147483647, %v2576_v39  ;;  %v1396_v11 = vand.u32 2147483648, %v2576_v39  ;;  %vm1390_vm2 = vweird.f32 %v2576_v39 }
 0x575   :  { %2082 = vrcp.f32 %v2578_v40  ;;  %v1448_v47 = vpop.f32.mrf.mxu2  ;;  %v1465_v48 = vpop.f32.mrf.mxu3  ;;  %v1431_v7 = vand.u32 2147483648, %v2578_v40  ;;  %v1429_v55 = vand.u32 2147483647, %v2578_v40  ;;  %vm1425_vm3 = vweird.f32 %v2578_v40 }
 0x576   :  { %2084 = vtanh.f32 %v1450_v46  ;;  %v1397_v61 = vor.u32 1.1754944e-38, %v1396_v11  ;;  %vm2593_vm4 = vcmp.eq.f32.partialorder %v1394_v49, 8.507059e+37  ;;  %v1920_v46 = vunpack.i.l.s16 %v2605_v25 }
 0x577   :  { %v1432_v9 = vor.u32 1.1754944e-38, %v1431_v7  ;;  %vm2599_vm5 = vcmp.eq.f32.partialorder %v1429_v55, 8.507059e+37  ;;  %v1921_v49 = vunpack.i.l.s16 %v1595_v31  ;;  %v1922_v11 = vunpack.i.l.s16 %v1596_v35 }
 0x578   :  { %v2079_v52 = vpop.eup %2078  ;;  %v1923_v7 = vunpack.i.l.s16 %v2608_v36  ;;  %v1924_v14 = vunpack.i.l.s16 %v2610_v37  ;;  %v1617_v55 = vrot.slane %v1919_v42, 6  ;;  %v1619_v24 = vrot.slane %v1920_v46, 5 }
 0x579   :  { %v2587_v56 = vadd.f32 1.0, %v2079_v52  ;;  %v1615_v52 = vrot.slane %v1918_v32, 7  ;;  %v1621_v57 = vrot.slane %v1921_v49, 4  ;;  %v1717_v31 = vrot.slane %v1920_v46, 6 }
 0x57a   :  { %v2081_v59 = vpop.eup %2080  ;;  %v1625_v18 = vrot.slane %v1923_v7, 2  ;;  %v1721_v37 = vrot.slane %v1922_v11, 4 }
 0x57b   :  { %v2083_v3 = vpop.eup %2082  ;;  %v1386_v5 = vmul.f32 %v2081_v59, %v2576_v39  ;;  %2086 = vrcp.f32 %v2587_v56  ;;  %vm1391_vm8 = vweird.f32 %v2081_v59  ;;  %v1616_v1 = vsel %vm1562_vm6, %v1615_v52, %v1917_v12 }
 0x57c   :  { %v1421_v20 = vmul.f32 %v2083_v3, %v2578_v40  ;;  %v2085_v33 = vpop.eup %2084  ;;  %vm1426_vm10 = vweird.f32 %v2083_v3  ;;  %vm1392_vm11 = vmor %vm1390_vm2, %vm1391_vm8  ;;  %v1623_v40 = vrot.slane %v1922_v11, 3  ;;  %v1618_v17 = vsel %vm1565_vm7, %v1617_v55, %v1616_v1 }
 0x57d   :  { %v1387_v26 = vsub.f32 1.0, %v1386_v5  ;;  %vm1427_vm12 = vmor %vm1425_vm3, %vm1426_vm10  ;;  %v1620_v10 = vsel %vm1568_vm9, %v1619_v24, %v1618_v17  ;;  %vm1577_vm3 = vcmask 1046534   ;;  %v1481_v25 = vand.u32 2147483647, %v2587_v56 }
 0x57e   :  { %v1422_v30 = vsub.f32 1.0, %v1421_v20  ;;  %v1622_v20 = vsel %vm1571_vm13, %v1621_v57, %v1620_v10  ;;  %v1554_v52 = vunpack.c.l.b16 %v2499_v4  ;;  %v1555_v24 = vunpack.c.l.b16 %v2525_v44 }
 0x57f   :  { %v1388_v8 = vmul.f32 %v2081_v59, %v1387_v26  ;;  %v1624_v21 = vsel %vm1574_vm15, %v1623_v40, %v1622_v20  ;;  %vm1482_vm8 = vcmp.eq.f32.partialorder %v1481_v25, 8.507059e+37  ;;  %v1553_v1 = vunpack.c.l.b16 %v2477_v60 }
 0x580   :  { %v1423_v38 = vmul.f32 %v2083_v3, %v1422_v30  ;;  %v1626_v22 = vsel %vm1577_vm3, %v1625_v18, %v1624_v21  ;;  %v1715_v30 = vrot.slane %v1919_v42, 7  ;;  %v1561_v57 = vrot.slane %v1554_v52, 7 }
 0x581   :  { %v2087_v47 = vpop.eup %2086  ;;  %v1389_v48 = vadd.f32 %v2081_v59, %v1388_v8  ;;  %v1719_v8 = vrot.slane %v1921_v49, 5  ;;  %v1748_v52 = vstv %s1927_s19 }
 0x582   :  { %v1424_v50 = vadd.f32 %v2083_v3, %v1423_v38  ;;  %v1473_v13 = vmul.f32 %v2087_v47, %v2587_v56  ;;  %vm1478_vm2 = vweird.f32 %v2087_v47  ;;  %v1563_v4 = vsel %vm1562_vm6, %v1561_v57, %v1553_v1 }
 0x583   :  { %v1393_v51 = vsel %vm1392_vm11, %v2081_v59, %v1389_v48  ;;  %v1723_v48 = vrot.slane %v1923_v7, 3 }
 0x584   :  { %v1398_v39 = vsel %vm2593_vm4, %v1397_v61, %v1393_v51  ;;  %v1428_v43 = vsel %vm1427_vm12, %v2083_v3, %v1424_v50  ;;  %v1474_v16 = vsub.f32 1.0, %v1473_v13  ;;  %v1627_v61 = vrot.slane %v1924_v14, 1 }
 0x585   :  { %v1433_v58 = vsel %vm2599_vm5, %v1432_v9, %v1428_v43  ;;  %v1488_v0 = vmul.f32 %v2085_v33, %v1398_v39  ;;  %vm1477_vm4 = vweird.f32 %v2587_v56  ;;  %v1725_v50 = vrot.slane %v1924_v14, 2  ;;  %v1547_v14 = vld [vmem:[#allocation1] sm:$0xf] }
 0x586   :  { %v1487_v59 = vmul.f32 %v1433_v58, %v2563_v63  ;;  %v1475_v5 = vmul.f32 %v2087_v47, %v1474_v16  ;;  %v1483_v63 = vand.u32 2147483648, %v2587_v56  ;;  %v1628_v26 = vsel %vm1580_vm1, %v1627_v61, %v1626_v22  ;;  %vm2639_vm5 = vmor %vm1477_vm4, %vm1478_vm2 }
 0x587   :  { %v1629_v28 = vpack.c.b16 %v1628_v26, %v1628_v26  ;;  %v1714_v56 = vsel %vm1562_vm6, %v1918_v32, %v1713_v29  ;;  %v1556_v39 = vunpack.c.l.b16 %v2543_v53  ;;  %v1557_v43 = vunpack.c.l.b16 %v2559_v62 }
 0x588   :  { %v1489_v3 = vadd.f32 %v1488_v0, %v1487_v59  ;;  %v1476_v9 = vadd.f32 %v2087_v47, %v1475_v5  ;;  %v1484_v35 = vor.u32 1.1754944e-38, %v1483_v63  ;;  %v1716_v38 = vsel %vm1565_vm7, %v1715_v30, %v1714_v56 }
 0x589   :  { %v1634_v36 = vsel %vm147_vm0, %v1629_v28, 0  ;;  %v1718_v46 = vsel %vm1568_vm9, %v1717_v31, %v1716_v38  ;;  %v1558_v16 = vunpack.c.l.b16 %v2573_v19  ;;  %v1559_v58 = vunpack.c.l.b16 %v1547_v14 }
 0x58a   :  { %2088 = vtanh.f32 %v1489_v3  ;;  %v1480_v33 = vsel %vm2639_vm5, %v2087_v47, %v1476_v9  ;;  %1643 = vmatpush.bf16.xpose.msrb.mxu0 %v1634_v36  ;;  %v1720_v49 = vsel %vm1571_vm13, %v1719_v8, %v1718_v46  ;;  %v1564_v0 = vrot.slane %v1555_v24, 6 }
 0x58b   :  { %v1485_v42 = vsel %vm1482_vm8, %v1484_v35, %v1480_v33  ;;  %v1722_v13 = vsel %vm1574_vm15, %v1721_v37, %v1720_v49  ;;  %v1567_v40 = vrot.slane %v1556_v39, 5  ;;  %v1570_v59 = vrot.slane %v1557_v43, 4 }
 0x58c   :  { %v1724_v2 = vsel %vm1577_vm3, %v1723_v48, %v1722_v13  ;;  %v1573_v5 = vrot.slane %v1558_v16, 3  ;;  %v1566_v44 = vsel %vm1565_vm7, %v1564_v0, %v1563_v4  ;;  %v1576_v18 = vrot.slane %v1559_v58, 2 }
 0x58d   :  { %v1726_v32 = vsel %vm1580_vm1, %v1725_v50, %v1724_v2  ;;  %v1569_v53 = vsel %vm1568_vm9, %v1567_v40, %v1566_v44  ;;  %v1519_v49 = vlaneseq }
 0x58e   :  { %v1727_v11 = vpack.c.b16 %v1726_v32, %v1726_v32  ;;  %v1572_v62 = vsel %vm1571_vm13, %v1570_v59, %v1569_v53 }
 0x58f   :  { %v1575_v19 = vsel %vm1574_vm15, %v1573_v5, %v1572_v62  ;;  %v1520_v13 = vand.u32 127, %v1519_v49 }
 0x590   :  { %v2089_v12 = vpop.eup %2088  ;;  %v1732_v7 = vsel %vm147_vm0, %v1727_v11, 0  ;;  %v1578_v60 = vsel %vm1577_vm3, %v1576_v18, %v1575_v19 }
 0x591   :  { %v1491_v47 = vmul.f32 %v2089_v12, %v1485_v42  ;;  %1741 = vmatpush.bf16.xpose.msrb.mxu1 %v1732_v7 }
 0x593   :  { %v1492_v51 = vpack.c.bf16 %v1491_v47, %v1491_v47 }
 0x595   :  { %1494 = vst.msk [vmem:[#allocation3 + $0x7] sm:$0x1] %vm562_vm14, %v1492_v51  ;;  %v1650_v51 = vstv %s1649_s7 }
 0x596   :  { %vm1651_vm14 = vcmp.lt.s32.totalorder %v1520_v13, %v1650_v51 }
 0x59c   :  { %v1502_v55 = vld [vmem:[#allocation3 + $0x7] sm:$0x1] }
 0x59d   :  { %1550 = vst [vmem:[#allocation1] ss:$9 sm:$0xff] %v1502_v55 }
 0x5a4   :  { %v1551_v17 = vld [vmem:[#allocation1] sm:$0xf] }
 0x5a5   :  { %v1560_v10 = vunpack.c.l.b16 %v1551_v17  ;;  %1666 = vst [vmem:[#allocation1] ss:$9 sm:$0xff] %v2457_v6 }
 0x5a7   :  { %v1579_v61 = vrot.slane %v1560_v10, 1 }
 0x5a9   :  { %v1581_v3 = vsel %vm1580_vm1, %v1579_v61, %v1578_v60 }
 0x5aa   :  { %v1582_v20 = vpack.c.b16 %v1581_v3, %v1581_v3 }
 0x5ac   :  { %1925 = vmatmul.msk.bf16.vlgmr.msrb.gmra.mxu0 %vm147_vm0, %v1582_v20  ;;  %v1667_v9 = vld [vmem:[#allocation1] sm:$0xf] }
 0x5ad   :  { %1669 = vst [vmem:[#allocation1] ss:$9 sm:$0xff] %v2479_v23  ;;  %v1690_v28 = vunpack.c.l.b16 %v1667_v9 }
 0x5b4   :  { %v1670_v21 = vld [vmem:[#allocation1] sm:$0xf] }
 0x5b5   :  { %1672 = vst [vmem:[#allocation1] ss:$9 sm:$0xff] %v2501_v34  ;;  %v1691_v30 = vunpack.c.l.b16 %v1670_v21 }
 0x5bc   :  { %v1673_v63 = vld [vmem:[#allocation1] sm:$0xf] }
 0x5bd   :  { %1675 = vst [vmem:[#allocation1] ss:$9 sm:$0xff] %v2527_v45  ;;  %v1692_v27 = vunpack.c.l.b16 %v1673_v63  ;;  %v1698_v45 = vrot.slane %v1690_v28, 1 }
 0x5bf   :  { %v1700_v33 = vrot.slane %v1692_v27, 7 }
 0x5c4   :  { %v1676_v6 = vld [vmem:[#allocation1] sm:$0xf] }
 0x5c5   :  { %1678 = vst [vmem:[#allocation1] ss:$9 sm:$0xff] %v2545_v54  ;;  %v1693_v23 = vunpack.c.l.b16 %v1676_v6  ;;  %v1699_v54 = vsel %vm1562_vm6, %v1691_v30, %v1698_v45  ;;  %vm1653_vm6 = vcmask 64512  }
 0x5c6   :  { %v1701_v56 = vsel %vm1565_vm7, %v1700_v33, %v1699_v54  ;;  %vm1749_vm7 = vcmp.lt.s32.totalorder %v1520_v13, %v1748_v52 }
 0x5c7   :  { %v1702_v8 = vrot.slane %v1693_v23, 6 }
 0x5c9   :  { %v1703_v38 = vsel %vm1568_vm9, %v1702_v8, %v1701_v56 }
 0x5cc   :  { %v1679_v22 = vld [vmem:[#allocation1] sm:$0xf] }
 0x5cd   :  { %1681 = vst [vmem:[#allocation1] ss:$9 sm:$0xff] %v2557_v41  ;;  %v1694_v29 = vunpack.c.l.b16 %v1679_v22 }
 0x5cf   :  { %v1704_v35 = vrot.slane %v1694_v29, 5 }
 0x5d1   :  { %v1705_v48 = vsel %vm1571_vm13, %v1704_v35, %v1703_v38 }
 0x5d4   :  { %v1682_v25 = vld [vmem:[#allocation1] sm:$0xf] }
 0x5d5   :  { %1684 = vst [vmem:[#allocation1] ss:$9 sm:$0xff] %v2571_v15  ;;  %v1695_v34 = vunpack.c.l.b16 %v1682_v25 }
 0x5d7   :  { %v1706_v36 = vrot.slane %v1695_v34, 4 }
 0x5d9   :  { %v1707_v12 = vsel %vm1574_vm15, %v1706_v36, %v1705_v48 }
 0x5dc   :  { %v1685_v26 = vld [vmem:[#allocation1] sm:$0xf] }
 0x5dd   :  { %1687 = vst [vmem:[#allocation1] ss:$9 sm:$0xff] %v1502_v55  ;;  %v1696_v31 = vunpack.c.l.b16 %v1685_v26 }
 0x5df   :  { %v1708_v15 = vrot.slane %v1696_v31, 3 }
 0x5e1   :  { %v1709_v46 = vsel %vm1577_vm3, %v1708_v15, %v1707_v12 }
 0x5e4   :  { %v1688_v41 = vld [vmem:[#allocation1] sm:$0xf] }
 0x5e5   :  { %v1697_v37 = vunpack.c.l.b16 %v1688_v41 }
 0x5e7   :  { %v1710_v42 = vrot.slane %v1697_v37, 2 }
 0x5e9   :  { %v1711_v50 = vsel %vm1580_vm1, %v1710_v42, %v1709_v46 }
 0x5ea   :  { %v1712_v47 = vpack.c.b16 %v1711_v50, %v1711_v50 }
 0x5ec   :  { %1926 = vmatmul.msk.bf16.vlgmr.msrb.gmra.mxu1 %vm147_vm0, %v1712_v47 }
 0x629   :  { %v1645_v2 = vpop.f32.mrf.mxu0 }
 0x62a   :  { %v1652_v32 = vsel %vm1651_vm14, %v1645_v2, -1e+30 }
 0x62b   :  { %v1654_v11 = vsel %vm1653_vm6, %v1652_v32, -inf }
 0x62c   :  { %1655 = vmax.xlane.f32.xlu0 %v1654_v11 }
 0x631   :  { %v1647_v7 = vpop.f32.mrf.mxu0 }
 0x669   :  { %v1743_v55 = vpop.f32.mrf.mxu1 }
 0x66a   :  { %v1750_v14 = vsel %vm1749_vm7, %v1743_v55, -1e+30 }
 0x66b   :  { %v1751_v24 = vsel %vm1653_vm6, %v1750_v14, -inf }
 0x66c   :  { %1752 = vmax.xlane.f32.xlu0 %v1751_v24 }
 0x671   :  { %v1745_v39 = vpop.f32.mrf.mxu1 }
 0x69f   :  { %v1656_v43 = vpop.xlane.xlu0 %1655 }
 0x6a0   :  { %v1657_v16 = vsub.f32 %v1652_v32, %v1656_v43 }
 0x6a2   :  { %v1658_v57 = vmul.f32 1.442695, %v1657_v16 }
 0x6a4   :  { %2090 = vpow2.f32 %v1658_v57 }
 0x6aa   :  { %v2091_v58 = vpop.eup %2090 }
 0x6ab   :  { %v1660_v0 = vsel %vm1653_vm6, %v2091_v58, 0.0 }
 0x6ac   :  { %1661 = vadd.xlane.f32.xlu1 %v1660_v0 }
 0x6df   :  { %v1753_v1 = vpop.xlane.xlu0 %1752 }
 0x6e0   :  { %v1754_v40 = vsub.f32 %v1750_v14, %v1753_v1 }
 0x6e2   :  { %v1755_v59 = vmul.f32 1.442695, %v1754_v40 }
 0x6e4   :  { %2092 = vpow2.f32 %v1755_v59 }
 0x6ea   :  { %v2093_v4 = vpop.eup %2092 }
 0x6eb   :  { %v1757_v5 = vsel %vm1653_vm6, %v2093_v4, 0.0 }
 0x6ec   :  { %1758 = vadd.xlane.f32.xlu1 %v1757_v5 }
 0x71f   :  { %v1662_v17 = vpop.xlane.xlu1 %1661 }
 0x720   :  { %2094 = vrcp.f32 %v1662_v17 }
 0x726   :  { %v2095_v44 = vpop.eup %2094 }
 0x727   :  { %v1664_v18 = vmul.f32 %v2095_v44, %v2091_v58 }
 0x729   :  { %1665 = vst.msk [vmem:[#allocation15] sm:$0xff] %vm1653_vm6, %v1664_v18 }
 0x75f   :  { %v1759_v10 = vpop.xlane.xlu1 %1758 }
 0x760   :  { %2096 = vrcp.f32 %v1759_v10 }
 0x766   :  { %v2097_v53 = vpop.eup %2096 }
 0x767   :  { %v1761_v62 = vmul.f32 %v2097_v53, %v2093_v4 }
 0x769   :  { %1763 = vst.msk [vmem:[#allocation15 + $0x8] sm:$0xff] %vm1653_vm6, %v1761_v62 }
 0x76a   :  { %1776 = dma.vmem_to_hbm [thread:$0]  %s1769_s20, 256, %s1771_s23, [#allocation6], %s2283_s24, %s2283_s24, %s2284_s5  }
 0x76b   :  { %2270 = dma.done.wait [#allocation6], 256  }
 0x76c   :  { %2271 = vsyncadd [#allocation6], 4294967040 }
 0x76d   :  { %1781 = vsyncpa [#allocation5], 1 }
 0x76e   :  { %1782 = vsyncpa [#allocation10], 1 }
 0x76f   :  { %1783 = vsyncpa [#allocation13], 1 }
 0x770   :  { %1784 = vsyncpa [#allocation6], 1 }
 0x771   :  { %1785 = vsyncpa [#allocation7], 1 }

</bundles_post_ra>
